<compile_context>
chip_gen: v7x
topology: tpu7x:2x2x1
jax: 0.10.0
libtpu: 0.0.40
codegen_flags: <defaults>
</compile_context>

<pallas_src>
import functools

import jax
import jax.numpy as jnp
from jax import lax
from jax.experimental import pallas as pl
from jax.experimental.pallas import tpu as pltpu

HEADS = 4
CONV_DIM = 64            # TransformerConv out_channels per head
HID = HEADS * CONV_DIM   # 256

VMEM_SPEC = pl.BlockSpec(memory_space=pltpu.MemorySpace.VMEM)


# --------------------------------------------------------------------------
# Fused forward kernel
# --------------------------------------------------------------------------
def _fused_gnn_kernel(x_ref, ei_ref, ea_ref,
                      fc00_w, fc00_b,
                      ef1_w, ef1_b, ef2_w, ef2_b, ef3_w, ef3_b,
                      w_qkvs, b_qkvs, we,
                      ln_g, ln_b, fc1_w, fc1_b, fc2_w, fc2_b,
                      o_ref, *, n, e, heads, out_ch):
    f32 = jnp.float32
    hid = heads * out_ch
    nn = n * n

    def mm(a, b):
        return jnp.dot(a, b, preferred_element_type=f32)

    # ---- node MLP: relu(x @ W + b) ------------------------------------------
    x1 = jnp.maximum(mm(x_ref[...], fc00_w[...]) + fc00_b[...], 0.0)     # [N, 64]

    # ---- edge MLP: 3 x (linear + relu) --------------------------------------
    ea = jnp.maximum(mm(ea_ref[...], ef1_w[...]) + ef1_b[...], 0.0)
    ea = jnp.maximum(mm(ea, ef2_w[...]) + ef2_b[...], 0.0)
    ea = jnp.maximum(mm(ea, ef3_w[...]) + ef3_b[...], 0.0)               # [E, 64]

    # ---- fused Q|K|V|skip projection (one wide MXU push) --------------------
    qkvs = mm(x1, w_qkvs[...]) + b_qkvs[...]                             # [N, 4*HID]
    q = qkvs[:, 0 * hid:1 * hid]
    k = qkvs[:, 1 * hid:2 * hid]
    v = qkvs[:, 2 * hid:3 * hid]
    skip = qkvs[:, 3 * hid:4 * hid]

    # ---- edge embedding projection ------------------------------------------
    e_proj = mm(ea, we[...])                                             # [E, HID]

    # ---- in-kernel densification operators (iota one-hots, kept in vregs) ---
    # Pd[r, e] = 1 iff edge e is (src -> dst) with dst*n + src == r
    src = ei_ref[0:1, :]                                                 # [1, E] i32
    dst = ei_ref[1:2, :]                                                 # [1, E] i32
    edge_flat = dst * n + src                                            # [1, E]
    r_iota = lax.broadcasted_iota(jnp.int32, (nn, e), 0)
    pd = jnp.where(r_iota == edge_flat, 1.0, 0.0)                        # [N*N, E]

    # R[r, i] = 1 iff r // n == i      (repeat q along src axis)
    rr = lax.broadcasted_iota(jnp.int32, (nn, n), 0)
    cc = lax.broadcasted_iota(jnp.int32, (nn, n), 1)
    r_mat = jnp.where((rr >= cc * n) & (rr < (cc + 1) * n), 1.0, 0.0)    # [N*N, N]

    # RT[i, r] = R^T built directly (avoids an XLU transpose)
    ri = lax.broadcasted_iota(jnp.int32, (n, nn), 0)
    rc = lax.broadcasted_iota(jnp.int32, (n, nn), 1)
    rt_mat = jnp.where((rc >= ri * n) & (rc < (ri + 1) * n), 1.0, 0.0)   # [N, N*N]

    # T[r, j] = 1 iff r % n == j       (repeat k/v along dst axis)
    tj = lax.broadcasted_iota(jnp.int32, (n, n, n), 1)
    tc = lax.broadcasted_iota(jnp.int32, (n, n, n), 2)
    t_mat = jnp.where(tj == tc, 1.0, 0.0).reshape(nn, n)                 # [N*N, N]

    # head selectors: HM[c, h] = 1 iff channel c belongs to head h; HM_T direct
    hr = lax.broadcasted_iota(jnp.int32, (hid, heads), 0)
    hc = lax.broadcasted_iota(jnp.int32, (hid, heads), 1)
    hm = jnp.where((hr >= hc * out_ch) & (hr < (hc + 1) * out_ch), 1.0, 0.0)
    hh = lax.broadcasted_iota(jnp.int32, (heads, hid), 0)
    hcc = lax.broadcasted_iota(jnp.int32, (heads, hid), 1)
    hm_t = jnp.where((hcc >= hh * out_ch) & (hcc < (hh + 1) * out_ch), 1.0, 0.0)

    # ---- densify edge embeddings + adjacency (MXU) ---------------------------
    e_dense = mm(pd, e_proj)                                             # [N*N, HID]
    adj = jnp.sum(pd, axis=1, keepdims=True)                             # [N*N, 1]
    mask2 = adj > 0.0                                                    # hoisted mask

    # ---- scores: s[i*n+j, h] = q_i . (k_j + e_ij) per head -------------------
    q_rep = mm(r_mat, q)                                                 # [N*N, HID]
    k_rep = mm(t_mat, k)                                                 # [N*N, HID]
    v_rep = mm(t_mat, v)                                                 # [N*N, HID]
    ke = k_rep + e_dense
    scores = mm(q_rep * ke, hm) * (1.0 / (out_ch ** 0.5))                # [N*N, H]
    neg = jnp.float32(-1e30)
    scores = jnp.where(mask2, scores, neg)

    # ---- segmented softmax over source nodes (per dst, per head) ------------
    s3 = scores.reshape(n, n, heads)                                     # [N, N, H]
    m = jnp.max(s3, axis=1, keepdims=True)                               # [N, 1, H]
    m = jnp.where(m <= neg * 0.5, 0.0, m)       # isolated dst -> alpha = 0
    adj3 = adj.reshape(n, n, 1)
    p3 = jnp.where(adj3 > 0.0, jnp.exp(s3 - m), 0.0)
    denom = jnp.sum(p3, axis=1, keepdims=True) + 1e-16                   # PyG eps
    alpha = (p3 * pl.reciprocal(denom, approx=True)).reshape(nn, heads)  # [N*N, H]

    # ---- aggregate: out_i = sum_j alpha_ij * (v_j + e_ij), concat heads ------
    alpha_exp = mm(alpha, hm_t)                                          # [N*N, HID]
    conv = mm(rt_mat, alpha_exp * (v_rep + e_dense)) + skip              # [N, HID]

    # ---- LayerNorm -> ReLU -> fc1 -> ReLU -> fc2 -> log_softmax --------------
    mean = jnp.mean(conv, axis=-1, keepdims=True)
    xc = conv - mean
    var = jnp.mean(xc * xc, axis=-1, keepdims=True)
    y = xc * lax.rsqrt(var + 1e-5) * ln_g[...] + ln_b[...]
    y = jnp.maximum(y, 0.0)
    y = jnp.maximum(mm(y, fc1_w[...]) + fc1_b[...], 0.0)
    z = mm(y, fc2_w[...]) + fc2_b[...]          # [N, 128] lane-dense (padded cols = -1e30)
    zmax = jnp.max(z, axis=-1, keepdims=True)
    zs = z - zmax
    lse = jnp.log(jnp.sum(jnp.exp(zs), axis=-1, keepdims=True))
    o_ref[...] = zs - lse


# --------------------------------------------------------------------------
# Parameter initialization (deterministic, synthetic weights)
# --------------------------------------------------------------------------
def init_params(key, num_node_features, num_edge_features, num_classes):
    def lin(k, fan_in, fan_out, scale=0.1, bias=True):
        kw, kb = jax.random.split(k)
        w = scale * jax.random.normal(kw, (fan_in, fan_out), jnp.float32)
        b = (scale * jax.random.normal(kb, (1, fan_out), jnp.float32)
             if bias else jnp.zeros((1, fan_out), jnp.float32))
        return w, b

    keys = jax.random.split(key, 12)
    p = {}
    p["fc00_w"], p["fc00_b"] = lin(keys[0], num_node_features, 64)
    p["efc1_w"], p["efc1_b"] = lin(keys[1], num_edge_features, 64)
    p["efc2_w"], p["efc2_b"] = lin(keys[2], 64, 64)
    p["efc3_w"], p["efc3_b"] = lin(keys[3], 64, 64)
    # TransformerConv(64, 64, heads=4, edge_dim=64): fuse Q|K|V|skip projections
    wq, bq = lin(keys[4], 64, HID)
    wk, bk = lin(keys[5], 64, HID)
    wv, bv = lin(keys[6], 64, HID)
    wskip, bskip = lin(keys[8], 64, HID)
    p["w_qkvs"] = jnp.concatenate([wq, wk, wv, wskip], axis=1)      # [64, 1024]
    p["b_qkvs"] = jnp.concatenate([bq, bk, bv, bskip], axis=1)      # [1, 1024]
    p["we"], _ = lin(keys[7], 64, HID, bias=False)                  # lin_edge: no bias
    # LayerNorm(256)
    p["ln_g"] = jnp.ones((1, HID), jnp.float32)
    p["ln_b"] = jnp.zeros((1, HID), jnp.float32)
    p["fc1_w"], p["fc1_b"] = lin(keys[9], HID, 128)
    # classifier padded to a lane-dense 128-wide output; padded logits get -1e30
    fc2_w, fc2_b = lin(keys[10], 128, num_classes)
    pad = (-num_classes) % 128
    if num_classes + pad < 128:
        pad = 128 - num_classes
    p["fc2_w"] = jnp.pad(fc2_w, ((0, 0), (0, pad)))
    p["fc2_b"] = jnp.pad(fc2_b, ((0, 0), (0, pad)), constant_values=-1e30)
    return p


# --------------------------------------------------------------------------
# Forward pass: one fused pallas_call, slice padded classes outside
# --------------------------------------------------------------------------
def forward(params, x, edge_index, edge_attr, num_classes):
    n = x.shape[0]
    e = edge_index.shape[1]
    pad_classes = params["fc2_w"].shape[1]

    kernel = functools.partial(_fused_gnn_kernel, n=n, e=e,
                               heads=HEADS, out_ch=CONV_DIM)
    args = (x, edge_index.astype(jnp.int32), edge_attr,
            params["fc00_w"], params["fc00_b"],
            params["efc1_w"], params["efc1_b"],
            params["efc2_w"], params["efc2_b"],
            params["efc3_w"], params["efc3_b"],
            params["w_qkvs"], params["b_qkvs"], params["we"],
            params["ln_g"], params["ln_b"],
            params["fc1_w"], params["fc1_b"],
            params["fc2_w"], params["fc2_b"])

    out_padded = pl.pallas_call(
        kernel,
        out_shape=jax.ShapeDtypeStruct((n, pad_classes), jnp.float32),
        in_specs=[VMEM_SPEC] * len(args),
        out_specs=VMEM_SPEC,
    )(*args)
    return out_padded[:, :num_classes]


# --------------------------------------------------------------------------
if __name__ == "__main__":
    num_nodes = 8
    num_node_features = 16
    num_edge_features = 8
    num_classes = 3

    key = jax.random.PRNGKey(0)
    kx, ke, kp = jax.random.split(key, 3)

    x = jax.random.normal(kx, (num_nodes, num_node_features), jnp.float32)
    srcs, dsts = [], []
    for i in range(num_nodes):
        for d in (1, 3):
            srcs.append((i + d) % num_nodes)
            dsts.append(i)
    edge_index = jnp.array([srcs, dsts], dtype=jnp.int32)              # [2, E], E = 16
    edge_attr = jax.random.normal(ke, (edge_index.shape[1], num_edge_features),
                                  jnp.float32)

    params = init_params(kp, num_node_features, num_edge_features, num_classes)

    out = forward(params, x, edge_index, edge_attr, num_classes)
    out = jax.block_until_ready(out)

    assert out.shape == (num_nodes, num_classes)
    assert bool(jnp.all(jnp.isfinite(out)))
    # log_softmax rows should sum (in prob space) to ~1
    assert bool(jnp.allclose(jnp.sum(jnp.exp(out), axis=1), 1.0, atol=1e-4))
    print("KERNEL_OK")
</pallas_src>

<mosaic_0001>
module attributes {stable_mosaic.version = 11 : i64} {
  func.func @_fused_gnn_kernel(%arg0: memref<8x16xf32, #tpu.memory_space<vmem>>, %arg1: memref<2x16xi32, #tpu.memory_space<vmem>>, %arg2: memref<16x8xf32, #tpu.memory_space<vmem>>, %arg3: memref<16x64xf32, #tpu.memory_space<vmem>>, %arg4: memref<1x64xf32, #tpu.memory_space<vmem>>, %arg5: memref<8x64xf32, #tpu.memory_space<vmem>>, %arg6: memref<1x64xf32, #tpu.memory_space<vmem>>, %arg7: memref<64x64xf32, #tpu.memory_space<vmem>>, %arg8: memref<1x64xf32, #tpu.memory_space<vmem>>, %arg9: memref<64x64xf32, #tpu.memory_space<vmem>>, %arg10: memref<1x64xf32, #tpu.memory_space<vmem>>, %arg11: memref<64x1024xf32, #tpu.memory_space<vmem>>, %arg12: memref<1x1024xf32, #tpu.memory_space<vmem>>, %arg13: memref<64x256xf32, #tpu.memory_space<vmem>>, %arg14: memref<1x256xf32, #tpu.memory_space<vmem>>, %arg15: memref<1x256xf32, #tpu.memory_space<vmem>>, %arg16: memref<256x128xf32, #tpu.memory_space<vmem>>, %arg17: memref<1x128xf32, #tpu.memory_space<vmem>>, %arg18: memref<128x128xf32, #tpu.memory_space<vmem>>, %arg19: memref<1x128xf32, #tpu.memory_space<vmem>>, %arg20: memref<8x128xf32, #tpu.memory_space<vmem>>) attributes {dimension_semantics = [], scalar_prefetch = 0 : i64, scratch_operands = 0 : i64, tpu.core_type = #tpu.core_type<tc>} {
    %c0 = arith.constant 0 : index
    %c0_0 = arith.constant 0 : index
    %0 = vector.load %arg0[%c0, %c0_0] : memref<8x16xf32, #tpu.memory_space<vmem>>, vector<8x16xf32>
    %c0_1 = arith.constant 0 : index
    %c0_2 = arith.constant 0 : index
    %1 = vector.load %arg3[%c0_1, %c0_2] : memref<16x64xf32, #tpu.memory_space<vmem>>, vector<16x64xf32>
    %cst = arith.constant dense<0.000000e+00> : vector<8x64xf32>
    %2 = tpu.matmul %0, %1, %cst {dimension_numbers = #tpu.dot_dimension_numbers<[1], [0], [0], [1], [0, 0, 1, 1], [], []>} : vector<8x16xf32>, vector<16x64xf32>, vector<8x64xf32> -> vector<8x64xf32>
    %c0_3 = arith.constant 0 : index
    %c0_4 = arith.constant 0 : index
    %3 = vector.load %arg4[%c0_3, %c0_4] : memref<1x64xf32, #tpu.memory_space<vmem>>, vector<1x64xf32>
    %4 = vector.broadcast %3 : vector<1x64xf32> to vector<8x64xf32>
    %5 = arith.addf %2, %4 : vector<8x64xf32>
    %cst_5 = arith.constant 0.000000e+00 : f32
    %6 = vector.broadcast %cst_5 : f32 to vector<8x64xf32>
    %7 = arith.maximumf %5, %6 : vector<8x64xf32>
    %c0_6 = arith.constant 0 : index
    %c0_7 = arith.constant 0 : index
    %8 = vector.load %arg2[%c0_6, %c0_7] : memref<16x8xf32, #tpu.memory_space<vmem>>, vector<16x8xf32>
    %c0_8 = arith.constant 0 : index
    %c0_9 = arith.constant 0 : index
    %9 = vector.load %arg5[%c0_8, %c0_9] : memref<8x64xf32, #tpu.memory_space<vmem>>, vector<8x64xf32>
    %cst_10 = arith.constant dense<0.000000e+00> : vector<16x64xf32>
    %10 = tpu.matmul %8, %9, %cst_10 {dimension_numbers = #tpu.dot_dimension_numbers<[1], [0], [0], [1], [0, 0, 1, 1], [], []>} : vector<16x8xf32>, vector<8x64xf32>, vector<16x64xf32> -> vector<16x64xf32>
    %c0_11 = arith.constant 0 : index
    %c0_12 = arith.constant 0 : index
    %11 = vector.load %arg6[%c0_11, %c0_12] : memref<1x64xf32, #tpu.memory_space<vmem>>, vector<1x64xf32>
    %12 = vector.broadcast %11 : vector<1x64xf32> to vector<16x64xf32>
    %13 = arith.addf %10, %12 : vector<16x64xf32>
    %cst_13 = arith.constant 0.000000e+00 : f32
    %14 = vector.broadcast %cst_13 : f32 to vector<16x64xf32>
    %15 = arith.maximumf %13, %14 : vector<16x64xf32>
    %c0_14 = arith.constant 0 : index
    %c0_15 = arith.constant 0 : index
    %16 = vector.load %arg7[%c0_14, %c0_15] : memref<64x64xf32, #tpu.memory_space<vmem>>, vector<64x64xf32>
    %cst_16 = arith.constant dense<0.000000e+00> : vector<16x64xf32>
    %17 = tpu.matmul %15, %16, %cst_16 {dimension_numbers = #tpu.dot_dimension_numbers<[1], [0], [0], [1], [0, 0, 1, 1], [], []>} : vector<16x64xf32>, vector<64x64xf32>, vector<16x64xf32> -> vector<16x64xf32>
    %c0_17 = arith.constant 0 : index
    %c0_18 = arith.constant 0 : index
    %18 = vector.load %arg8[%c0_17, %c0_18] : memref<1x64xf32, #tpu.memory_space<vmem>>, vector<1x64xf32>
    %19 = vector.broadcast %18 : vector<1x64xf32> to vector<16x64xf32>
    %20 = arith.addf %17, %19 : vector<16x64xf32>
    %cst_19 = arith.constant 0.000000e+00 : f32
    %21 = vector.broadcast %cst_19 : f32 to vector<16x64xf32>
    %22 = arith.maximumf %20, %21 : vector<16x64xf32>
    %c0_20 = arith.constant 0 : index
    %c0_21 = arith.constant 0 : index
    %23 = vector.load %arg9[%c0_20, %c0_21] : memref<64x64xf32, #tpu.memory_space<vmem>>, vector<64x64xf32>
    %cst_22 = arith.constant dense<0.000000e+00> : vector<16x64xf32>
    %24 = tpu.matmul %22, %23, %cst_22 {dimension_numbers = #tpu.dot_dimension_numbers<[1], [0], [0], [1], [0, 0, 1, 1], [], []>} : vector<16x64xf32>, vector<64x64xf32>, vector<16x64xf32> -> vector<16x64xf32>
    %c0_23 = arith.constant 0 : index
    %c0_24 = arith.constant 0 : index
    %25 = vector.load %arg10[%c0_23, %c0_24] : memref<1x64xf32, #tpu.memory_space<vmem>>, vector<1x64xf32>
    %26 = vector.broadcast %25 : vector<1x64xf32> to vector<16x64xf32>
    %27 = arith.addf %24, %26 : vector<16x64xf32>
    %cst_25 = arith.constant 0.000000e+00 : f32
    %28 = vector.broadcast %cst_25 : f32 to vector<16x64xf32>
    %29 = arith.maximumf %27, %28 : vector<16x64xf32>
    %c0_26 = arith.constant 0 : index
    %c0_27 = arith.constant 0 : index
    %30 = vector.load %arg11[%c0_26, %c0_27] : memref<64x1024xf32, #tpu.memory_space<vmem>>, vector<64x1024xf32>
    %cst_28 = arith.constant dense<0.000000e+00> : vector<8x1024xf32>
    %31 = tpu.matmul %7, %30, %cst_28 {dimension_numbers = #tpu.dot_dimension_numbers<[1], [0], [0], [1], [0, 0, 1, 1], [], []>} : vector<8x64xf32>, vector<64x1024xf32>, vector<8x1024xf32> -> vector<8x1024xf32>
    %c0_29 = arith.constant 0 : index
    %c0_30 = arith.constant 0 : index
    %32 = vector.load %arg12[%c0_29, %c0_30] : memref<1x1024xf32, #tpu.memory_space<vmem>>, vector<1x1024xf32>
    %33 = vector.broadcast %32 : vector<1x1024xf32> to vector<8x1024xf32>
    %34 = arith.addf %31, %33 : vector<8x1024xf32>
    %35 = vector.extract_strided_slice %34 {offsets = [0, 0], sizes = [8, 256], strides = [1, 1]} : vector<8x1024xf32> to vector<8x256xf32>
    %36 = vector.extract_strided_slice %34 {offsets = [0, 256], sizes = [8, 256], strides = [1, 1]} : vector<8x1024xf32> to vector<8x256xf32>
    %37 = vector.extract_strided_slice %34 {offsets = [0, 512], sizes = [8, 256], strides = [1, 1]} : vector<8x1024xf32> to vector<8x256xf32>
    %38 = vector.extract_strided_slice %34 {offsets = [0, 768], sizes = [8, 256], strides = [1, 1]} : vector<8x1024xf32> to vector<8x256xf32>
    %c0_31 = arith.constant 0 : index
    %c0_32 = arith.constant 0 : index
    %39 = vector.load %arg13[%c0_31, %c0_32] : memref<64x256xf32, #tpu.memory_space<vmem>>, vector<64x256xf32>
    %cst_33 = arith.constant dense<0.000000e+00> : vector<16x256xf32>
    %40 = tpu.matmul %29, %39, %cst_33 {dimension_numbers = #tpu.dot_dimension_numbers<[1], [0], [0], [1], [0, 0, 1, 1], [], []>} : vector<16x64xf32>, vector<64x256xf32>, vector<16x256xf32> -> vector<16x256xf32>
    %c0_34 = arith.constant 0 : index
    %c0_35 = arith.constant 0 : index
    %41 = vector.load %arg1[%c0_34, %c0_35] : memref<2x16xi32, #tpu.memory_space<vmem>>, vector<1x16xi32>
    %c1 = arith.constant 1 : index
    %c0_36 = arith.constant 0 : index
    %42 = vector.load %arg1[%c1, %c0_36] : memref<2x16xi32, #tpu.memory_space<vmem>>, vector<1x16xi32>
    %c8_i32 = arith.constant 8 : i32
    %43 = vector.broadcast %c8_i32 : i32 to vector<1x16xi32>
    %44 = arith.muli %42, %43 : vector<1x16xi32>
    %45 = arith.addi %44, %41 : vector<1x16xi32>
    %46 = tpu.iota {dimensions = array<i32: 0>} : vector<64x16xi32>
    %47 = vector.broadcast %45 : vector<1x16xi32> to vector<64x16xi32>
    %48 = arith.cmpi eq, %46, %47 : vector<64x16xi32>
    %cst_37 = arith.constant 1.000000e+00 : f32
    %cst_38 = arith.constant 0.000000e+00 : f32
    %49 = vector.broadcast %cst_37 : f32 to vector<64x16xf32>
    %50 = vector.broadcast %cst_38 : f32 to vector<64x16xf32>
    %51 = arith.select %48, %49, %50 : vector<64x16xi1>, vector<64x16xf32>
    %52 = tpu.iota {dimensions = array<i32: 0>} : vector<64x8xi32>
    %53 = tpu.iota {dimensions = array<i32: 1>} : vector<64x8xi32>
    %c8_i32_39 = arith.constant 8 : i32
    %54 = vector.broadcast %c8_i32_39 : i32 to vector<64x8xi32>
    %55 = arith.muli %53, %54 : vector<64x8xi32>
    %56 = arith.cmpi sge, %52, %55 : vector<64x8xi32>
    %c1_i32 = arith.constant 1 : i32
    %57 = vector.broadcast %c1_i32 : i32 to vector<64x8xi32>
    %58 = arith.addi %53, %57 : vector<64x8xi32>
    %c8_i32_40 = arith.constant 8 : i32
    %59 = vector.broadcast %c8_i32_40 : i32 to vector<64x8xi32>
    %60 = arith.muli %58, %59 : vector<64x8xi32>
    %61 = arith.cmpi slt, %52, %60 : vector<64x8xi32>
    %62 = arith.andi %56, %61 : vector<64x8xi1>
    %cst_41 = arith.constant 1.000000e+00 : f32
    %cst_42 = arith.constant 0.000000e+00 : f32
    %63 = vector.broadcast %cst_41 : f32 to vector<64x8xf32>
    %64 = vector.broadcast %cst_42 : f32 to vector<64x8xf32>
    %65 = arith.select %62, %63, %64 : vector<64x8xi1>, vector<64x8xf32>
    %66 = tpu.iota {dimensions = array<i32: 0>} : vector<8x64xi32>
    %67 = tpu.iota {dimensions = array<i32: 1>} : vector<8x64xi32>
    %c8_i32_43 = arith.constant 8 : i32
    %68 = vector.broadcast %c8_i32_43 : i32 to vector<8x64xi32>
    %69 = arith.muli %66, %68 : vector<8x64xi32>
    %70 = arith.cmpi sge, %67, %69 : vector<8x64xi32>
    %c1_i32_44 = arith.constant 1 : i32
    %71 = vector.broadcast %c1_i32_44 : i32 to vector<8x64xi32>
    %72 = arith.addi %66, %71 : vector<8x64xi32>
    %c8_i32_45 = arith.constant 8 : i32
    %73 = vector.broadcast %c8_i32_45 : i32 to vector<8x64xi32>
    %74 = arith.muli %72, %73 : vector<8x64xi32>
    %75 = arith.cmpi slt, %67, %74 : vector<8x64xi32>
    %76 = arith.andi %70, %75 : vector<8x64xi1>
    %cst_46 = arith.constant 1.000000e+00 : f32
    %cst_47 = arith.constant 0.000000e+00 : f32
    %77 = vector.broadcast %cst_46 : f32 to vector<8x64xf32>
    %78 = vector.broadcast %cst_47 : f32 to vector<8x64xf32>
    %79 = arith.select %76, %77, %78 : vector<8x64xi1>, vector<8x64xf32>
    %80 = tpu.iota {dimensions = array<i32: 1>} : vector<8x8x8xi32>
    %81 = tpu.iota {dimensions = array<i32: 2>} : vector<8x8x8xi32>
    %82 = arith.cmpi eq, %80, %81 : vector<8x8x8xi32>
    %cst_48 = arith.constant 1.000000e+00 : f32
    %cst_49 = arith.constant 0.000000e+00 : f32
    %83 = vector.broadcast %cst_48 : f32 to vector<8x8x8xf32>
    %84 = vector.broadcast %cst_49 : f32 to vector<8x8x8xf32>
    %85 = arith.select %82, %83, %84 : vector<8x8x8xi1>, vector<8x8x8xf32>
    %86 = vector.shape_cast %85 : vector<8x8x8xf32> to vector<64x8xf32>
    %87 = tpu.iota {dimensions = array<i32: 0>} : vector<256x4xi32>
    %88 = tpu.iota {dimensions = array<i32: 1>} : vector<256x4xi32>
    %c64_i32 = arith.constant 64 : i32
    %89 = vector.broadcast %c64_i32 : i32 to vector<256x4xi32>
    %90 = arith.muli %88, %89 : vector<256x4xi32>
    %91 = arith.cmpi sge, %87, %90 : vector<256x4xi32>
    %c1_i32_50 = arith.constant 1 : i32
    %92 = vector.broadcast %c1_i32_50 : i32 to vector<256x4xi32>
    %93 = arith.addi %88, %92 : vector<256x4xi32>
    %c64_i32_51 = arith.constant 64 : i32
    %94 = vector.broadcast %c64_i32_51 : i32 to vector<256x4xi32>
    %95 = arith.muli %93, %94 : vector<256x4xi32>
    %96 = arith.cmpi slt, %87, %95 : vector<256x4xi32>
    %97 = arith.andi %91, %96 : vector<256x4xi1>
    %cst_52 = arith.constant 1.000000e+00 : f32
    %cst_53 = arith.constant 0.000000e+00 : f32
    %98 = vector.broadcast %cst_52 : f32 to vector<256x4xf32>
    %99 = vector.broadcast %cst_53 : f32 to vector<256x4xf32>
    %100 = arith.select %97, %98, %99 : vector<256x4xi1>, vector<256x4xf32>
    %101 = tpu.iota {dimensions = array<i32: 0>} : vector<4x256xi32>
    %102 = tpu.iota {dimensions = array<i32: 1>} : vector<4x256xi32>
    %c64_i32_54 = arith.constant 64 : i32
    %103 = vector.broadcast %c64_i32_54 : i32 to vector<4x256xi32>
    %104 = arith.muli %101, %103 : vector<4x256xi32>
    %105 = arith.cmpi sge, %102, %104 : vector<4x256xi32>
    %c1_i32_55 = arith.constant 1 : i32
    %106 = vector.broadcast %c1_i32_55 : i32 to vector<4x256xi32>
    %107 = arith.addi %101, %106 : vector<4x256xi32>
    %c64_i32_56 = arith.constant 64 : i32
    %108 = vector.broadcast %c64_i32_56 : i32 to vector<4x256xi32>
    %109 = arith.muli %107, %108 : vector<4x256xi32>
    %110 = arith.cmpi slt, %102, %109 : vector<4x256xi32>
    %111 = arith.andi %105, %110 : vector<4x256xi1>
    %cst_57 = arith.constant 1.000000e+00 : f32
    %cst_58 = arith.constant 0.000000e+00 : f32
    %112 = vector.broadcast %cst_57 : f32 to vector<4x256xf32>
    %113 = vector.broadcast %cst_58 : f32 to vector<4x256xf32>
    %114 = arith.select %111, %112, %113 : vector<4x256xi1>, vector<4x256xf32>
    %cst_59 = arith.constant dense<0.000000e+00> : vector<64x256xf32>
    %115 = tpu.matmul %51, %40, %cst_59 {dimension_numbers = #tpu.dot_dimension_numbers<[1], [0], [0], [1], [0, 0, 1, 1], [], []>} : vector<64x16xf32>, vector<16x256xf32>, vector<64x256xf32> -> vector<64x256xf32>
    %cst_60 = arith.constant dense<0.000000e+00> : vector<64xf32>
    %116 = vector.multi_reduction <add>, %51, %cst_60 [1] : vector<64x16xf32> to vector<64xf32>
    %117 = vector.shape_cast %116 : vector<64xf32> to vector<64x1xf32>
    %cst_61 = arith.constant 0.000000e+00 : f32
    %118 = vector.broadcast %cst_61 : f32 to vector<64x1xf32>
    %119 = arith.cmpf ogt, %117, %118 : vector<64x1xf32>
    %cst_62 = arith.constant dense<0.000000e+00> : vector<64x256xf32>
    %120 = tpu.matmul %65, %35, %cst_62 {dimension_numbers = #tpu.dot_dimension_numbers<[1], [0], [0], [1], [0, 0, 1, 1], [], []>} : vector<64x8xf32>, vector<8x256xf32>, vector<64x256xf32> -> vector<64x256xf32>
    %cst_63 = arith.constant dense<0.000000e+00> : vector<64x256xf32>
    %121 = tpu.matmul %86, %36, %cst_63 {dimension_numbers = #tpu.dot_dimension_numbers<[1], [0], [0], [1], [0, 0, 1, 1], [], []>} : vector<64x8xf32>, vector<8x256xf32>, vector<64x256xf32> -> vector<64x256xf32>
    %cst_64 = arith.constant dense<0.000000e+00> : vector<64x256xf32>
    %122 = tpu.matmul %86, %37, %cst_64 {dimension_numbers = #tpu.dot_dimension_numbers<[1], [0], [0], [1], [0, 0, 1, 1], [], []>} : vector<64x8xf32>, vector<8x256xf32>, vector<64x256xf32> -> vector<64x256xf32>
    %123 = arith.addf %121, %115 : vector<64x256xf32>
    %124 = arith.mulf %120, %123 : vector<64x256xf32>
    %cst_65 = arith.constant dense<0.000000e+00> : vector<64x4xf32>
    %125 = tpu.matmul %124, %100, %cst_65 {dimension_numbers = #tpu.dot_dimension_numbers<[1], [0], [0], [1], [0, 0, 1, 1], [], []>} : vector<64x256xf32>, vector<256x4xf32>, vector<64x4xf32> -> vector<64x4xf32>
    %cst_66 = arith.constant 1.250000e-01 : f32
    %126 = vector.broadcast %cst_66 : f32 to vector<64x4xf32>
    %127 = arith.mulf %125, %126 : vector<64x4xf32>
    %cst_67 = arith.constant -1.000000e+30 : f32
    %128 = vector.shape_cast %119 : vector<64x1xi1> to vector<64x1xi1>
    %129 = vector.broadcast %128 : vector<64x1xi1> to vector<64x4xi1>
    %130 = vector.broadcast %cst_67 : f32 to vector<64x4xf32>
    %131 = arith.select %129, %127, %130 : vector<64x4xi1>, vector<64x4xf32>
    %132 = vector.shape_cast %131 : vector<64x4xf32> to vector<8x8x4xf32>
    %cst_68 = arith.constant dense<0xFF800000> : vector<8x4xf32>
    %133 = vector.multi_reduction <maximumf>, %132, %cst_68 [1] : vector<8x8x4xf32> to vector<8x4xf32>
    %134 = vector.shape_cast %133 : vector<8x4xf32> to vector<8x1x4xf32>
    %cst_69 = arith.constant -1.000000e+30 : f32
    %cst_70 = arith.constant 5.000000e-01 : f32
    %135 = arith.mulf %cst_69, %cst_70 : f32
    %136 = vector.broadcast %135 : f32 to vector<8x1x4xf32>
    %137 = arith.cmpf ole, %134, %136 : vector<8x1x4xf32>
    %cst_71 = arith.constant 0.000000e+00 : f32
    %138 = vector.broadcast %cst_71 : f32 to vector<8x1x4xf32>
    %139 = arith.select %137, %138, %134 : vector<8x1x4xi1>, vector<8x1x4xf32>
    %140 = vector.shape_cast %117 : vector<64x1xf32> to vector<8x8x1xf32>
    %cst_72 = arith.constant 0.000000e+00 : f32
    %141 = vector.broadcast %cst_72 : f32 to vector<8x8x1xf32>
    %142 = arith.cmpf ogt, %140, %141 : vector<8x8x1xf32>
    %143 = vector.broadcast %139 : vector<8x1x4xf32> to vector<8x8x4xf32>
    %144 = arith.subf %132, %143 : vector<8x8x4xf32>
    %145 = math.exp %144 : vector<8x8x4xf32>
    %cst_73 = arith.constant 0.000000e+00 : f32
    %146 = vector.shape_cast %142 : vector<8x8x1xi1> to vector<8x8x1xi1>
    %147 = vector.broadcast %146 : vector<8x8x1xi1> to vector<8x8x4xi1>
    %148 = vector.broadcast %cst_73 : f32 to vector<8x8x4xf32>
    %149 = arith.select %147, %145, %148 : vector<8x8x4xi1>, vector<8x8x4xf32>
    %cst_74 = arith.constant dense<0.000000e+00> : vector<8x4xf32>
    %150 = vector.multi_reduction <add>, %149, %cst_74 [1] : vector<8x8x4xf32> to vector<8x4xf32>
    %151 = vector.shape_cast %150 : vector<8x4xf32> to vector<8x1x4xf32>
    %cst_75 = arith.constant 1.000000e-16 : f32
    %152 = vector.broadcast %cst_75 : f32 to vector<8x1x4xf32>
    %153 = arith.addf %151, %152 : vector<8x1x4xf32>
    %154 = tpu.reciprocal %153 {approx = true} : vector<8x1x4xf32> -> vector<8x1x4xf32>
    %155 = vector.broadcast %154 : vector<8x1x4xf32> to vector<8x8x4xf32>
    %156 = arith.mulf %149, %155 : vector<8x8x4xf32>
    %157 = vector.shape_cast %156 : vector<8x8x4xf32> to vector<64x4xf32>
    %cst_76 = arith.constant dense<0.000000e+00> : vector<64x256xf32>
    %158 = tpu.matmul %157, %114, %cst_76 {dimension_numbers = #tpu.dot_dimension_numbers<[1], [0], [0], [1], [0, 0, 1, 1], [], []>} : vector<64x4xf32>, vector<4x256xf32>, vector<64x256xf32> -> vector<64x256xf32>
    %159 = arith.addf %122, %115 : vector<64x256xf32>
    %160 = arith.mulf %158, %159 : vector<64x256xf32>
    %cst_77 = arith.constant dense<0.000000e+00> : vector<8x256xf32>
    %161 = tpu.matmul %79, %160, %cst_77 {dimension_numbers = #tpu.dot_dimension_numbers<[1], [0], [0], [1], [0, 0, 1, 1], [], []>} : vector<8x64xf32>, vector<64x256xf32>, vector<8x256xf32> -> vector<8x256xf32>
    %162 = arith.addf %161, %38 : vector<8x256xf32>
    %cst_78 = arith.constant dense<0.000000e+00> : vector<8xf32>
    %163 = vector.multi_reduction <add>, %162, %cst_78 [1] : vector<8x256xf32> to vector<8xf32>
    %164 = vector.shape_cast %163 : vector<8xf32> to vector<8x1xf32>
    %cst_79 = arith.constant 2.560000e+02 : f32
    %165 = vector.broadcast %cst_79 : f32 to vector<8x1xf32>
    %166 = arith.divf %164, %165 : vector<8x1xf32>
    %167 = vector.broadcast %166 : vector<8x1xf32> to vector<8x256xf32>
    %168 = arith.subf %162, %167 : vector<8x256xf32>
    %169 = arith.mulf %168, %168 : vector<8x256xf32>
    %cst_80 = arith.constant dense<0.000000e+00> : vector<8xf32>
    %170 = vector.multi_reduction <add>, %169, %cst_80 [1] : vector<8x256xf32> to vector<8xf32>
    %171 = vector.shape_cast %170 : vector<8xf32> to vector<8x1xf32>
    %cst_81 = arith.constant 2.560000e+02 : f32
    %172 = vector.broadcast %cst_81 : f32 to vector<8x1xf32>
    %173 = arith.divf %171, %172 : vector<8x1xf32>
    %cst_82 = arith.constant 9.99999974E-6 : f32
    %174 = vector.broadcast %cst_82 : f32 to vector<8x1xf32>
    %175 = arith.addf %173, %174 : vector<8x1xf32>
    %176 = math.rsqrt %175 : vector<8x1xf32>
    %177 = vector.broadcast %176 : vector<8x1xf32> to vector<8x256xf32>
    %178 = arith.mulf %168, %177 : vector<8x256xf32>
    %c0_83 = arith.constant 0 : index
    %c0_84 = arith.constant 0 : index
    %179 = vector.load %arg14[%c0_83, %c0_84] : memref<1x256xf32, #tpu.memory_space<vmem>>, vector<1x256xf32>
    %180 = vector.broadcast %179 : vector<1x256xf32> to vector<8x256xf32>
    %181 = arith.mulf %178, %180 : vector<8x256xf32>
    %c0_85 = arith.constant 0 : index
    %c0_86 = arith.constant 0 : index
    %182 = vector.load %arg15[%c0_85, %c0_86] : memref<1x256xf32, #tpu.memory_space<vmem>>, vector<1x256xf32>
    %183 = vector.broadcast %182 : vector<1x256xf32> to vector<8x256xf32>
    %184 = arith.addf %181, %183 : vector<8x256xf32>
    %cst_87 = arith.constant 0.000000e+00 : f32
    %185 = vector.broadcast %cst_87 : f32 to vector<8x256xf32>
    %186 = arith.maximumf %184, %185 : vector<8x256xf32>
    %c0_88 = arith.constant 0 : index
    %c0_89 = arith.constant 0 : index
    %187 = vector.load %arg16[%c0_88, %c0_89] : memref<256x128xf32, #tpu.memory_space<vmem>>, vector<256x128xf32>
    %cst_90 = arith.constant dense<0.000000e+00> : vector<8x128xf32>
    %188 = tpu.matmul %186, %187, %cst_90 {dimension_numbers = #tpu.dot_dimension_numbers<[1], [0], [0], [1], [0, 0, 1, 1], [], []>} : vector<8x256xf32>, vector<256x128xf32>, vector<8x128xf32> -> vector<8x128xf32>
    %c0_91 = arith.constant 0 : index
    %c0_92 = arith.constant 0 : index
    %189 = vector.load %arg17[%c0_91, %c0_92] : memref<1x128xf32, #tpu.memory_space<vmem>>, vector<1x128xf32>
    %190 = vector.broadcast %189 : vector<1x128xf32> to vector<8x128xf32>
    %191 = arith.addf %188, %190 : vector<8x128xf32>
    %cst_93 = arith.constant 0.000000e+00 : f32
    %192 = vector.broadcast %cst_93 : f32 to vector<8x128xf32>
    %193 = arith.maximumf %191, %192 : vector<8x128xf32>
    %c0_94 = arith.constant 0 : index
    %c0_95 = arith.constant 0 : index
    %194 = vector.load %arg18[%c0_94, %c0_95] : memref<128x128xf32, #tpu.memory_space<vmem>>, vector<128x128xf32>
    %cst_96 = arith.constant dense<0.000000e+00> : vector<8x128xf32>
    %195 = tpu.matmul %193, %194, %cst_96 {dimension_numbers = #tpu.dot_dimension_numbers<[1], [0], [0], [1], [0, 0, 1, 1], [], []>} : vector<8x128xf32>, vector<128x128xf32>, vector<8x128xf32> -> vector<8x128xf32>
    %c0_97 = arith.constant 0 : index
    %c0_98 = arith.constant 0 : index
    %196 = vector.load %arg19[%c0_97, %c0_98] : memref<1x128xf32, #tpu.memory_space<vmem>>, vector<1x128xf32>
    %197 = vector.broadcast %196 : vector<1x128xf32> to vector<8x128xf32>
    %198 = arith.addf %195, %197 : vector<8x128xf32>
    %cst_99 = arith.constant dense<0xFF800000> : vector<8xf32>
    %199 = vector.multi_reduction <maximumf>, %198, %cst_99 [1] : vector<8x128xf32> to vector<8xf32>
    %200 = vector.shape_cast %199 : vector<8xf32> to vector<8x1xf32>
    %201 = vector.broadcast %200 : vector<8x1xf32> to vector<8x128xf32>
    %202 = arith.subf %198, %201 : vector<8x128xf32>
    %203 = math.exp %202 : vector<8x128xf32>
    %cst_100 = arith.constant dense<0.000000e+00> : vector<8xf32>
    %204 = vector.multi_reduction <add>, %203, %cst_100 [1] : vector<8x128xf32> to vector<8xf32>
    %205 = vector.shape_cast %204 : vector<8xf32> to vector<8x1xf32>
    %206 = math.log %205 : vector<8x1xf32>
    %207 = vector.broadcast %206 : vector<8x1xf32> to vector<8x128xf32>
    %208 = arith.subf %202, %207 : vector<8x128xf32>
    %c0_101 = arith.constant 0 : index
    %c0_102 = arith.constant 0 : index
    %209 = vector.load %arg20[%c0_101, %c0_102] : memref<8x128xf32, #tpu.memory_space<vmem>>, vector<8x128xf32>
    tpu.vector_store %arg20[%c0_101, %c0_102], %208 {strides = array<i32>} : memref<8x128xf32, #tpu.memory_space<vmem>>, vector<8x128xf32>,
    return
  }
}

</mosaic_0001>

<bundles_post_ra>
// kernel: tpu_custom_call.1
= control target key start
LH: loop header
LB: loop body
LE: loop exit
PB: predicated region body
PF: predicated region fallthrough
CT: control target
= control target key end

     0   :  { %s4777_s0 = inlined_call_operand.vmem [shape: f32[8,16], index: 0, kind: input, shape index: {}]   ;;  %s4778_s1 = inlined_call_operand.vmem [shape: s32[2,16], index: 1, kind: input, shape index: {}]   ;;  %s4779_s2 = inlined_call_operand.vmem [shape: f32[16,8], index: 2, kind: input, shape index: {}]   ;;  %s4780_s3 = inlined_call_operand.vmem [shape: f32[16,64], index: 3, kind: input, shape index: {}]   ;;  %s4781_s4 = inlined_call_operand.hbm [shape: f32[1,64], index: 4, kind: input, shape index: {}]   ;;  %s4782_s5 = inlined_call_operand.vmem [shape: f32[8,64], index: 5, kind: input, shape index: {}]   ;;  %s4783_s6 = inlined_call_operand.hbm [shape: f32[1,64], index: 6, kind: input, shape index: {}]   ;;  %s4784_s7 = inlined_call_operand.hbm [shape: f32[64,64], index: 7, kind: input, shape index: {}]   ;;  %s4785_s8 = inlined_call_operand.vmem [shape: f32[1,64], index: 8, kind: input, shape index: {}]   ;;  %s4786_s9 = inlined_call_operand.hbm [shape: f32[64,64], index: 9, kind: input, shape index: {}]   ;;  %s4787_s10 = inlined_call_operand.vmem [shape: f32[1,64], index: 10, kind: input, shape index: {}]   ;;  %s4788_s11 = inlined_call_operand.hbm [shape: f32[64,1024], index: 11, kind: input, shape index: {}]   ;;  %s4789_s12 = inlined_call_operand.vmem [shape: f32[1,1024], index: 12, kind: input, shape index: {}]   ;;  %s4790_s13 = inlined_call_operand.hbm [shape: f32[64,256], index: 13, kind: input, shape index: {}]   ;;  %s4791_s14 = inlined_call_operand.vmem [shape: f32[1,256], index: 14, kind: input, shape index: {}]   ;;  %s4792_s15 = inlined_call_operand.vmem [shape: f32[1,256], index: 15, kind: input, shape index: {}]   ;;  %s4793_s16 = inlined_call_operand.hbm [shape: f32[256,128], index: 16, kind: input, shape index: {}]   ;;  %s4794_s17 = inlined_call_operand.vmem [shape: f32[1,128], index: 17, kind: input, shape index: {}]   ;;  %s4795_s18 = inlined_call_operand.hbm [shape: f32[128,128], index: 18, kind: input, shape index: {}]   ;;  %s4796_s19 = inlined_call_operand.vmem [shape: f32[1,128], index: 19, kind: input, shape index: {}]   ;;  %s4797_s20 = inlined_call_operand.hbm [shape: f32[8,128], index: 20, kind: output, shape index: {}]  }
   0x1   :  { %4832 = sst [smem:[#allocation23_spill]] %s4777_s0 }
   0x2   :  { %4833 = sst [smem:[#allocation24_spill]] %s4778_s1 }
   0x3   :  { %4834 = sst [smem:[#allocation25_spill]] %s4779_s2 }
   0x4   :  { %4835 = sst [smem:[#allocation26_spill]] %s4780_s3 }
   0x5   :  { %4836 = sst [smem:[#allocation27_spill]] %s4781_s4 }
   0x6   :  { %25 = vsyncpa [#allocation3], 0 }
   0x7   :  { %26 = vsyncpa [#allocation6], 0 }
   0x8   :  { %27 = vsyncpa [#allocation9], 0 }
   0x9   :  { %28 = vsyncpa [#allocation12], 0 }
   0xa   :  { %29 = vsyncpa [#allocation15], 0 }
   0xb   :  { %30 = vsyncpa [#allocation4], 0  ;;  %s3478_s1 = smov [#allocation5]   ;;  %s3268_s2 = scalar_lea.hbm %s4783_s6, 16 }
   0xc   :  { %s57_s22 = sshll.u32 %s3478_s1, 4  ;;  %p3269_p0 = scmp.ne.s32.totalorder %s4783_s6, %s3268_s2  ;;  %s58_s22 = int_to_ptr.vmem [resolvable:$true] %s57_s22 }
   0xd   :  { %p3272_p1 = scmp.lt.u32.totalorder %s3268_s2, %s4783_s6 }
   0xf   :  { %p3274_p2 = pnand %p3272_p1, %p3269_p0 }
  0x11   :  { %3277 = shalt.err (!%p3274_p2)
}
  0x12   :  { %s3278_s28 = scalar_lea.vmem %s58_s22, 16  ;;  %s3282_s4 = scalar_lea.vmem %s58_s22, 32 }
  0x13   :  { %p3279_p3 = scmp.ne.s32.totalorder %s58_s22, %s3278_s28  ;;  %p3283_p4 = scmp.lt.s32.totalorder %s58_s22, %s58_s22 }
  0x14   :  { %p3284_p5 = scmp.lt.s32.totalorder %s3282_s4, %s3278_s28 }
  0x16   :  { %p3285_p6 = por %p3284_p5, %p3283_p4 }
  0x18   :  { %p3286_p7 = pnand %p3285_p6, %p3279_p3 }
  0x1a   :  { %3289 = shalt.err (!%p3286_p7)
}
  0x1b   :  { %60 = dma.hbm_to_vmem [thread:$0]  %s4783_s6, 16, %s58_s22, [#allocation6]  }
  0x1c   :  { %s3479_s0 = smov [#allocation8]   ;;  %s3480_s1 = smov [#allocation11]  }
  0x1d   :  { %s80_s21 = sshll.u32 %s3479_s0, 4  ;;  %s108_s23 = sshll.u32 %s3480_s1, 4  ;;  %s81_s21 = int_to_ptr.vmem [resolvable:$true] %s80_s21  ;;  %s109_s23 = int_to_ptr.vmem [resolvable:$true] %s108_s23 }
  0x1e   :  { %s3290_s25 = scalar_lea.hbm %s4786_s9, 1024 }
  0x1f   :  { %p3291_p8 = scmp.ne.s32.totalorder %s4786_s9, %s3290_s25  ;;  %p3294_p9 = scmp.lt.u32.totalorder %s3290_s25, %s4786_s9 }
  0x21   :  { %p3296_p10 = pnand %p3294_p9, %p3291_p8 }
  0x23   :  { %3299 = shalt.err (!%p3296_p10)
}
  0x24   :  { %s3300_s6 = scalar_lea.vmem %s81_s21, 1024  ;;  %p3305_p12 = scmp.lt.s32.totalorder %s81_s21, %s81_s21 }
  0x25   :  { %p3301_p11 = scmp.ne.s32.totalorder %s81_s21, %s3300_s6  ;;  %p3306_p13 = scmp.lt.s32.totalorder %s3300_s6, %s3300_s6 }
  0x27   :  { %p3307_p0 = por %p3306_p13, %p3305_p12 }
  0x29   :  { %p3308_p1 = pnand %p3307_p0, %p3301_p11 }
  0x2b   :  { %3311 = shalt.err (!%p3308_p1)
}
  0x2c   :  { %s4802_s22 = smov 128   ;;  %s4804_s4 = smov 8  }
  0x2d   :  { %86 = dma.hbm_to_vmem [thread:$0]  %s4786_s9, 1024, %s81_s21, [#allocation9], %s4802_s22, %s4802_s22, %s4804_s4  }
  0x2e   :  { %s3312_s24 = scalar_lea.hbm %s4790_s13, 2048 }
  0x2f   :  { %p3313_p2 = scmp.ne.s32.totalorder %s4790_s13, %s3312_s24  ;;  %p3316_p3 = scmp.lt.u32.totalorder %s3312_s24, %s4790_s13 }
  0x31   :  { %p3318_p4 = pnand %p3316_p3, %p3313_p2 }
  0x33   :  { %3321 = shalt.err (!%p3318_p4)
}
  0x34   :  { %s3322_s27 = scalar_lea.vmem %s109_s23, 2048  ;;  %p3327_p6 = scmp.lt.s32.totalorder %s109_s23, %s109_s23 }
  0x35   :  { %p3323_p5 = scmp.ne.s32.totalorder %s109_s23, %s3322_s27  ;;  %p3328_p7 = scmp.lt.s32.totalorder %s3322_s27, %s3322_s27 }
  0x37   :  { %p3329_p8 = por %p3328_p7, %p3327_p6 }
  0x39   :  { %p3330_p9 = pnand %p3329_p8, %p3323_p5 }
  0x3b   :  { %3333 = shalt.err (!%p3330_p9)
}
  0x3c   :  { %s3483_s9 = smov 256   ;;  %s3484_s21 = smov 16  }
  0x3d   :  { %114 = dma.hbm_to_vmem [thread:$0]  %s4790_s13, 2048, %s109_s23, [#allocation12], %s3483_s9, %s3483_s9, %s3484_s21  }
  0x3e   :  { %s3485_s29 = smov [#allocation2]   ;;  %s3486_s0 = smov [#allocation7]  }
  0x3f   :  { %s45_s30 = sshll.u32 %s3485_s29, 4  ;;  %s66_s1 = sshll.u32 %s3486_s0, 4  ;;  %s46_s30 = int_to_ptr.vmem [resolvable:$true] %s45_s30  ;;  %s67_s1 = int_to_ptr.vmem [resolvable:$true] %s66_s1 }
  0x40   :  { %s4837_s25 = sld [smem:[#allocation27_spill]] }
  0x46   :  { %s3334_s3 = scalar_lea.hbm %s4837_s25, 16 }
  0x47   :  { %p3335_p10 = scmp.ne.s32.totalorder %s4837_s25, %s3334_s3  ;;  %p3338_p11 = scmp.lt.u32.totalorder %s3334_s3, %s4837_s25 }
  0x49   :  { %p3340_p12 = pnand %p3338_p11, %p3335_p10 }
  0x4b   :  { %3343 = shalt.err (!%p3340_p12)
}
  0x4c   :  { %s3344_s13 = scalar_lea.vmem %s46_s30, 16  ;;  %s3348_s23 = scalar_lea.vmem %s46_s30, 32 }
  0x4d   :  { %p3345_p13 = scmp.ne.s32.totalorder %s46_s30, %s3344_s13  ;;  %p3349_p0 = scmp.lt.s32.totalorder %s46_s30, %s46_s30 }
  0x4e   :  { %p3350_p1 = scmp.lt.s32.totalorder %s3348_s23, %s3344_s13 }
  0x50   :  { %p3351_p2 = por %p3350_p1, %p3349_p0 }
  0x52   :  { %p3352_p3 = pnand %p3351_p2, %p3345_p13 }
  0x54   :  { %3355 = shalt.err (!%p3352_p3)
}
  0x55   :  { %48 = dma.hbm_to_vmem [thread:$0]  %s4837_s25, 16, %s46_s30, [#allocation3]  }
  0x56   :  { %s3356_s22 = scalar_lea.hbm %s4784_s7, 1024 }
  0x57   :  { %p3357_p4 = scmp.ne.s32.totalorder %s4784_s7, %s3356_s22  ;;  %p3360_p5 = scmp.lt.u32.totalorder %s3356_s22, %s4784_s7 }
  0x59   :  { %p3362_p6 = pnand %p3360_p5, %p3357_p4 }
  0x5b   :  { %3365 = shalt.err (!%p3362_p6)
}
  0x5c   :  { %s3366_s2 = scalar_lea.vmem %s67_s1, 1024  ;;  %p3371_p8 = scmp.lt.s32.totalorder %s67_s1, %s67_s1 }
  0x5d   :  { %p3367_p7 = scmp.ne.s32.totalorder %s67_s1, %s3366_s2  ;;  %p3372_p9 = scmp.lt.s32.totalorder %s3366_s2, %s3366_s2 }
  0x5f   :  { %p3373_p10 = por %p3372_p9, %p3371_p8 }
  0x61   :  { %p3374_p11 = pnand %p3373_p10, %p3367_p7 }
  0x63   :  { %3377 = shalt.err (!%p3374_p11)
}
  0x64   :  { %s4838_s30 = smov 8   ;;  %s4839_s25 = smov 128  }
  0x65   :  { %72 = dma.hbm_to_vmem [thread:$0]  %s4784_s7, 1024, %s67_s1, [#allocation6], %s4839_s25, %s4839_s25, %s4838_s30  }
  0x66   :  { %s3487_s27 = smov [#allocation10]   ;;  %s3378_s21 = scalar_lea.hbm %s4788_s11, 8192 }
  0x67   :  { %s94_s13 = sshll.u32 %s3487_s27, 4  ;;  %p3379_p12 = scmp.ne.s32.totalorder %s4788_s11, %s3378_s21  ;;  %s95_s13 = int_to_ptr.vmem [resolvable:$true] %s94_s13 }
  0x68   :  { %p3382_p13 = scmp.lt.u32.totalorder %s3378_s21, %s4788_s11 }
  0x6a   :  { %p3384_p0 = pnand %p3382_p13, %p3379_p12 }
  0x6c   :  { %3387 = shalt.err (!%p3384_p0)
}
  0x6d   :  { %s3388_s29 = scalar_lea.vmem %s95_s13, 8192  ;;  %p3393_p2 = scmp.lt.s32.totalorder %s95_s13, %s95_s13 }
  0x6e   :  { %p3389_p1 = scmp.ne.s32.totalorder %s95_s13, %s3388_s29  ;;  %p3394_p3 = scmp.lt.s32.totalorder %s3388_s29, %s3388_s29 }
  0x70   :  { %p3395_p4 = por %p3394_p3, %p3393_p2 }
  0x72   :  { %p3396_p5 = pnand %p3395_p4, %p3389_p1 }
  0x74   :  { %3399 = shalt.err (!%p3396_p5)
}
  0x75   :  { %s3488_s7 = smov 1024   ;;  %s3489_s1 = smov 64  }
  0x76   :  { %100 = dma.hbm_to_vmem [thread:$0]  %s4788_s11, 8192, %s95_s13, [#allocation9], %s3488_s7, %s3488_s7, %s3489_s1  }
  0x77   :  { %s3490_s2 = smov [#allocation13]   ;;  %s3491_s26 = smov [#allocation14]  }
  0x78   :  { %s124_s3 = sshll.u32 %s3490_s2, 4  ;;  %s138_s27 = sshll.u32 %s3491_s26, 4  ;;  %s125_s3 = int_to_ptr.vmem [resolvable:$true] %s124_s3  ;;  %s3680_s27 = int_to_ptr.vmem [resolvable:$true] %s138_s27 }
  0x79   :  { %s3400_s21 = scalar_lea.hbm %s4793_s16, 4096 }
  0x7a   :  { %p3401_p6 = scmp.ne.s32.totalorder %s4793_s16, %s3400_s21  ;;  %p3404_p7 = scmp.lt.u32.totalorder %s3400_s21, %s4793_s16 }
  0x7c   :  { %p3406_p8 = pnand %p3404_p7, %p3401_p6 }
  0x7e   :  { %3409 = shalt.err (!%p3406_p8)
}
  0x7f   :  { %s3410_s11 = scalar_lea.vmem %s125_s3, 4096  ;;  %p3415_p10 = scmp.lt.s32.totalorder %s125_s3, %s125_s3 }
  0x80   :  { %p3411_p9 = scmp.ne.s32.totalorder %s125_s3, %s3410_s11  ;;  %p3416_p11 = scmp.lt.s32.totalorder %s3410_s11, %s3410_s11 }
  0x82   :  { %p3417_p12 = por %p3416_p11, %p3415_p10 }
  0x84   :  { %p3418_p13 = pnand %p3417_p12, %p3411_p9 }
  0x86   :  { %3421 = shalt.err (!%p3418_p13)
}
  0x87   :  { %130 = dma.hbm_to_vmem [thread:$0]  %s4793_s16, 4096, %s125_s3, [#allocation12], %s4839_s25, %s4839_s25, %s4838_s30  }
  0x88   :  { %s3422_s0 = scalar_lea.hbm %s4795_s18, 2048 }
  0x89   :  { %p3423_p0 = scmp.ne.s32.totalorder %s4795_s18, %s3422_s0  ;;  %p3426_p1 = scmp.lt.u32.totalorder %s3422_s0, %s4795_s18 }
  0x8b   :  { %p3428_p2 = pnand %p3426_p1, %p3423_p0 }
  0x8d   :  { %3431 = shalt.err (!%p3428_p2)
}
  0x8e   :  { %s3432_s9 = scalar_lea.vmem %s3680_s27, 2048  ;;  %p3437_p4 = scmp.lt.s32.totalorder %s3680_s27, %s3680_s27 }
  0x8f   :  { %p3433_p3 = scmp.ne.s32.totalorder %s3680_s27, %s3432_s9  ;;  %p3438_p5 = scmp.lt.s32.totalorder %s3432_s9, %s3432_s9 }
  0x91   :  { %p3439_p6 = por %p3438_p5, %p3437_p4 }
  0x93   :  { %p3440_p7 = pnand %p3439_p6, %p3433_p3 }
  0x95   :  { %3443 = shalt.err (!%p3440_p7)
}
  0x96   :  { %144 = dma.hbm_to_vmem [thread:$0]  %s4795_s18, 2048, %s3680_s27, [#allocation15], %s4839_s25, %s4839_s25, %s4838_s30  }
  0x97   :  { %3466 = dma.done.wait [#allocation3], 16  }
  0x98   :  { %3467 = vsyncadd [#allocation3], 4294967280 }
  0x99   :  { %3468 = dma.done.wait [#allocation6], 1040  }
  0x9a   :  { %3469 = vsyncadd [#allocation6], 4294966256 }
  0x9b   :  { %3470 = dma.done.wait [#allocation9], 9216  }
  0x9c   :  { %3471 = vsyncadd [#allocation9], 4294958080 }
  0x9d   :  { %3472 = dma.done.wait [#allocation12], 6144  }
  0x9e   :  { %3473 = vsyncadd [#allocation12], 4294961152 }
  0x9f   :  { %3474 = dma.done.wait [#allocation15], 2048  }
  0xa0   :  { %3475 = vsyncadd [#allocation15], 4294965248  ;;  %v3492_v0 = vmov 0.0|0.0   ;;  %vm4806_vm0 = vmmov 0   ;;  %v3494_v1 = vmov 0.0   ;;  %s4840_s30 = sld [smem:[#allocation26_spill]] }
  0xa1   :  { %2983 = vmatprep.subr.bf16.mxu1 %v3492_v0  ;;  %2902 = vmatprep.mubr.msk.f32.mxu1 %vm4806_vm0, %v3494_v1  ;;  %v258_v5 = vld [vmem:[%s4782_s5] sm:$0xff]  ;;  %v351_v7 = vld [vmem:[#allocation7 + $0x8] sm:$0xff]  ;;  %s4841_s11 = sld [smem:[#allocation23_spill]]  ;;  %vm4807_vm1 = vcmask 130048   ;;  %s4842_s7 = sld [smem:[#allocation25_spill]]  ;;  %vm4808_vm2 = vcmask 64512  }
  0xa2   :  { %v350_v6 = vld [vmem:[#allocation7] sm:$0xff]  ;;  %v352_v11 = vld [vmem:[#allocation7 + $0x10] sm:$0xff]  ;;  %v353_v12 = vld [vmem:[#allocation7 + $0x18] sm:$0xff]  ;;  %vm4809_vm3 = vcmask 523264   ;;  %s4959_s16 = sld [smem:[#allocation24_spill]] }
  0xa3   :  { %v2986_v10 = vpack.c.bf16 %v351_v7, %v350_v6  ;;  %v2990_v14 = vpack.c.bf16 %v353_v12, %v352_v11  ;;  %v354_v15 = vld [vmem:[#allocation7 + $0x20] sm:$0xff]  ;;  %v355_v16 = vld [vmem:[#allocation7 + $0x28] sm:$0xff]  ;;  %v356_v18 = vld [vmem:[#allocation7 + $0x30] sm:$0xff] }
  0xa4   :  { %v2994_v17 = vpack.c.bf16 %v355_v16, %v354_v15  ;;  %v357_v19 = vld [vmem:[#allocation7 + $0x38] sm:$0xff]  ;;  %v548_v21 = vld [vmem:[#allocation10 + $0x8] sm:$0xff]  ;;  %v449_v24 = vld [vmem:[#allocation8] sm:$0xff] }
  0xa5   :  { %v2998_v20 = vpack.c.bf16 %v357_v19, %v356_v18  ;;  %v556_v22 = vld [vmem:[#allocation10 + $0x48] sm:$0xff]  ;;  %v451_v26 = vld [vmem:[#allocation8 + $0x10] sm:$0xff]  ;;  %v452_v28 = vld [vmem:[#allocation8 + $0x18] sm:$0xff] }
  0xa6   :  { %v172_v2 = vld [vmem:[%s4840_s30] sm:$0xff]  ;;  %v173_v3 = vld [vmem:[%s4840_s30 + $0x8] sm:$0xff]  ;;  %v3018_v23 = vpack.c.bf16 %v556_v22, %v548_v21  ;;  %v3006_v29 = vpack.c.bf16 %v452_v28, %v451_v26  ;;  %v455_v28 = vld [vmem:[#allocation8 + $0x30] sm:$0xff] }
  0xa7   :  { %v2984_v4 = vpack.c.bf16 %v173_v3, %v172_v2  ;;  %v171_v8 = vld [vmem:[%s4841_s11] sm:$0xff]  ;;  %v257_v13 = vld [vmem:[%s4842_s7 + $0x8] sm:$0xff] }
  0xa8   :  { %v256_v9 = vld [vmem:[%s4842_s7] sm:$0xff]  ;;  %v450_v25 = vld [vmem:[#allocation8 + $0x8] sm:$0xff] }
  0xa9   :  { %2985 = vmatpush3.bf16.msra.mxu1 %v2984_v4  ;;  %v3002_v27 = vpack.c.bf16 %v450_v25, %v449_v24  ;;  %v453_v30 = vld [vmem:[#allocation8 + $0x20] sm:$0xff]  ;;  %v454_v31 = vld [vmem:[#allocation8 + $0x28] sm:$0xff]  ;;  %v2672_v35 = vld [vmem:[#allocation5] ss:$0 sm:$0xff] }
  0xaa   :  { %2905 = vmatprep.subr.mxu1 %v258_v5  ;;  %v3010_v32 = vpack.c.bf16 %v454_v31, %v453_v30  ;;  %v547_v39 = vld [vmem:[#allocation10] sm:$0xff]  ;;  %v564_v42 = vld [vmem:[#allocation10 + $0x88] sm:$0xff]  ;;  %v2670_v62 = vld [vmem:[#allocation2] ss:$0 sm:$0xff] }
  0xab   :  { %3003 = vmatprep.subr.bf16.mxu0 %v3002_v27  ;;  %v555_v40 = vld [vmem:[#allocation10 + $0x40] sm:$0xff]  ;;  %v572_v43 = vld [vmem:[#allocation10 + $0xc8] sm:$0xff] }
  0xac   :  { %2903 = vmatmul.mubr.msk.f32.vlgmr.msra.gmra.mrb[0].mxu1 %vm4807_vm1, %v171_v8  ;;  %3005 = vmatpush3.bf16.msra.mxu0 %v3002_v27  ;;  %v3020_v45 = vpack.c.bf16 %v555_v40, %v547_v39  ;;  %v3022_v47 = vpack.c.bf16 %v572_v43, %v564_v42  ;;  %v563_v48 = vld [vmem:[#allocation10 + $0x80] sm:$0xff]  ;;  %v580_v50 = vld [vmem:[#allocation10 + $0x108] sm:$0xff] }
  0xad   :  { %2906 = vmatpush3.msra.mxu1 %v258_v5  ;;  %2907 = vmatprep.mubr.msk.f32.mxu1 %vm4808_vm2, %v256_v9  ;;  %v571_v49 = vld [vmem:[#allocation10 + $0xc0] sm:$0xff]  ;;  %v588_v51 = vld [vmem:[#allocation10 + $0x148] sm:$0xff] }
  0xae   :  { %2987 = vmatprep.subr.bf16.mxu1 %v2986_v10  ;;  %3007 = vmatprep.subr.bf16.mxu0 %v3006_v29  ;;  %v3024_v52 = vpack.c.bf16 %v571_v49, %v563_v48  ;;  %v3026_v53 = vpack.c.bf16 %v588_v51, %v580_v50  ;;  %v579_v54 = vld [vmem:[#allocation10 + $0x100] sm:$0xff]  ;;  %v596_v56 = vld [vmem:[#allocation10 + $0x188] sm:$0xff]  ;;  %v950_v50 = vld [vmem:[#allocation11 + $0x50] sm:$0xff] }
  0xaf   :  { %v587_v55 = vld [vmem:[#allocation10 + $0x140] sm:$0xff]  ;;  %v604_v57 = vld [vmem:[#allocation10 + $0x1c8] sm:$0xff] }
  0xb0   :  { %2908 = vmatmul.mubr.msk.f32.vlgmr.msra.gmra.mrb[2].mxu1 %vm4808_vm2, %v257_v13  ;;  %3009 = vmatpush3.bf16.msra.mxu0 %v3006_v29  ;;  %v3028_v58 = vpack.c.bf16 %v587_v55, %v579_v54  ;;  %v3030_v59 = vpack.c.bf16 %v604_v57, %v596_v56  ;;  %v595_v60 = vld [vmem:[#allocation10 + $0x180] sm:$0xff]  ;;  %v552_v63 = vld [vmem:[#allocation10 + $0x28] sm:$0xff]  ;;  %v456_v29 = vld [vmem:[#allocation8 + $0x38] sm:$0xff] }
  0xb1   :  { %2989 = vmatpush3.bf16.msra.mxu1 %v2986_v10  ;;  %3011 = vmatprep.subr.bf16.mxu0 %v3010_v32  ;;  %v603_v61 = vld [vmem:[#allocation10 + $0x1c0] sm:$0xff]  ;;  %v560_v2 = vld [vmem:[#allocation10 + $0x68] sm:$0xff]  ;;  %v3014_v30 = vpack.c.bf16 %v456_v29, %v455_v28  ;;  %v954_v56 = vld [vmem:[#allocation11 + $0x70] sm:$0xff] }
  0xb2   :  { %2991 = vmatprep.subr.bf16.mxu1 %v2990_v14  ;;  %v3032_v3 = vpack.c.bf16 %v603_v61, %v595_v60  ;;  %v3050_v5 = vpack.c.bf16 %v560_v2, %v552_v63  ;;  %v551_v6 = vld [vmem:[#allocation10 + $0x20] sm:$0xff]  ;;  %v568_v8 = vld [vmem:[#allocation10 + $0xa8] sm:$0xff]  ;;  %v557_v63 = vld [vmem:[#allocation10 + $0x50] sm:$0xff] }
  0xb3   :  { %v559_v7 = vld [vmem:[#allocation10 + $0x60] sm:$0xff]  ;;  %v576_v9 = vld [vmem:[#allocation10 + $0xe8] sm:$0xff]  ;;  %v554_v29 = vld [vmem:[#allocation10 + $0x38] sm:$0xff] }
  0xb4   :  { %3013 = vmatpush3.bf16.msra.mxu0 %v3010_v32  ;;  %v3052_v10 = vpack.c.bf16 %v559_v7, %v551_v6  ;;  %v3054_v12 = vpack.c.bf16 %v576_v9, %v568_v8  ;;  %v567_v13 = vld [vmem:[#allocation10 + $0xa0] sm:$0xff]  ;;  %v584_v15 = vld [vmem:[#allocation10 + $0x128] sm:$0xff]  ;;  %v943_v32 = vld [vmem:[#allocation11 + $0x18] sm:$0xff] }
  0xb5   :  { %2993 = vmatpush3.bf16.msra.mxu1 %v2990_v14  ;;  %v575_v14 = vld [vmem:[#allocation10 + $0xe0] sm:$0xff]  ;;  %v592_v16 = vld [vmem:[#allocation10 + $0x168] sm:$0xff]  ;;  %3015 = vmatprep.subr.bf16.mxu0 %v3014_v30 }
  0xb6   :  { %2995 = vmatprep.subr.bf16.mxu1 %v2994_v17  ;;  %v3058_v18 = vpack.c.bf16 %v592_v16, %v584_v15  ;;  %v583_v19 = vld [vmem:[#allocation10 + $0x120] sm:$0xff]  ;;  %v600_v21 = vld [vmem:[#allocation10 + $0x1a8] sm:$0xff] }
  0xb7   :  { %v608_v22 = vld [vmem:[#allocation10 + $0x1e8] sm:$0xff]  ;;  %v599_v25 = vld [vmem:[#allocation10 + $0x1a0] sm:$0xff] }
  0xb8   :  { %v3062_v24 = vpack.c.bf16 %v608_v22, %v600_v21  ;;  %v607_v26 = vld [vmem:[#allocation10 + $0x1e0] sm:$0xff]  ;;  %v941_v31 = vld [vmem:[#allocation11 + $0x8] sm:$0xff]  ;;  %3017 = vmatpush3.bf16.msra.mxu0 %v3014_v30  ;;  %v598_v21 = vld [vmem:[#allocation10 + $0x198] sm:$0xff] }
  0xb9   :  { %2997 = vmatpush3.bf16.msra.mxu1 %v2994_v17  ;;  %v3056_v17 = vpack.c.bf16 %v575_v14, %v567_v13  ;;  %v3064_v27 = vpack.c.bf16 %v607_v26, %v599_v25  ;;  %v945_v40 = vld [vmem:[#allocation11 + $0x28] sm:$0xff]  ;;  %v944_v43 = vld [vmem:[#allocation11 + $0x20] sm:$0xff]  ;;  %v582_v13 = vld [vmem:[#allocation10 + $0x118] sm:$0xff] }
  0xba   :  { %2999 = vmatprep.subr.bf16.mxu1 %v2998_v20  ;;  %v948_v49 = vld [vmem:[#allocation11 + $0x40] sm:$0xff]  ;;  %v590_v14 = vld [vmem:[#allocation10 + $0x158] sm:$0xff]  ;;  %v597_v26 = vld [vmem:[#allocation10 + $0x190] sm:$0xff] }
  0xbb   :  { %v3092_v51 = vpack.c.bf16 %v950_v50, %v948_v49  ;;  %v952_v55 = vld [vmem:[#allocation11 + $0x60] sm:$0xff]  ;;  %v606_v22 = vld [vmem:[#allocation10 + $0x1d8] sm:$0xff]  ;;  %v593_v49 = vld [vmem:[#allocation10 + $0x170] sm:$0xff] }
  0xbc   :  { %v3096_v57 = vpack.c.bf16 %v954_v56, %v952_v55  ;;  %v3046_v25 = vpack.c.bf16 %v606_v22, %v598_v21  ;;  %v562_v30 = vld [vmem:[#allocation10 + $0x78] sm:$0xff]  ;;  %v609_v55 = vld [vmem:[#allocation10 + $0x1f0] sm:$0xff]  ;;  %v4920_v22 = vmov 0 }
  0xbd   :  { %3001 = vmatpush3.bf16.msra.mxu1 %v2998_v20  ;;  %v591_v20 = vld [vmem:[#allocation10 + $0x160] sm:$0xff]  ;;  %v602_v50 = vld [vmem:[#allocation10 + $0x1b8] sm:$0xff] }
  0xbe   :  { %3019 = vmatprep.subr.bf16.mxu1 %v3018_v23  ;;  %v3060_v23 = vpack.c.bf16 %v591_v20, %v583_v19  ;;  %v589_v19 = vld [vmem:[#allocation10 + $0x150] sm:$0xff] }
 0x17f   :  { %v251_v33 = vpop.f32.mrb[0].mxu1 }
 0x180   :  { %v2904_v34 = vpop.f32.mrb[1].mxu1  ;;  %v252_v4 = vadd.f32 %v2670_v62, %v251_v33  ;;  %v3082_v33 = vpack.c.bf16 %v943_v32, %v941_v31  ;;  %v549_v62 = vld [vmem:[#allocation10 + $0x10] sm:$0xff] }
 0x181   :  { %v550_v34 = vld [vmem:[#allocation10 + $0x18] sm:$0xff]  ;;  %v3036_v7 = vpack.c.bf16 %v557_v63, %v549_v62 }
 0x182   :  { %v3744_v11 = vmax.f32 %v252_v4, 0.0  ;;  %v574_v4 = vld [vmem:[#allocation10 + $0xd8] sm:$0xff] }
 0x183   :  { %v2909_v36 = vpop.f32.mrb[2].mxu1 }
 0x184   :  { %v345_v37 = vadd.f32 %v2909_v36, %v2672_v35  ;;  %v339_v38 = vpop.f32.mrb[3].mxu1  ;;  %v940_v36 = vld [vmem:[#allocation11] sm:$0xff] }
 0x185   :  { %v340_v41 = vadd.f32 %v2672_v35, %v339_v38  ;;  %v558_v35 = vld [vmem:[#allocation10 + $0x58] sm:$0xff]  ;;  %v942_v38 = vld [vmem:[#allocation11 + $0x10] sm:$0xff] }
 0x186   :  { %v349_v46 = vmax.f32 %v345_v37, 0.0  ;;  %v3034_v37 = vpack.c.bf16 %v558_v35, %v550_v34  ;;  %v3084_v39 = vpack.c.bf16 %v942_v38, %v940_v36  ;;  %v3066_v34 = vpack.c.bf16 %v562_v30, %v554_v29  ;;  %v553_v35 = vld [vmem:[#allocation10 + $0x30] sm:$0xff]  ;;  %v570_v38 = vld [vmem:[#allocation10 + $0xb8] sm:$0xff] }
 0x187   :  { %v348_v44 = vmax.f32 %v340_v41, 0.0  ;;  %v947_v41 = vld [vmem:[#allocation11 + $0x38] sm:$0xff]  ;;  %v561_v36 = vld [vmem:[#allocation10 + $0x70] sm:$0xff]  ;;  %v4855_v30 = vmov 0 }
 0x188   :  { %3035 = vmatprep.subr.bf16.mxu0 %v3034_v37  ;;  %v3086_v42 = vpack.c.bf16 %v947_v41, %v945_v40  ;;  %v3068_v40 = vpack.c.bf16 %v561_v36, %v553_v35  ;;  %v4861_v36 = vmov 0 }
 0x189   :  { %2926 = vmatprep.mubr.msk.f32.mxu1 %vm4809_vm3, %v348_v44  ;;  %v946_v44 = vld [vmem:[#allocation11 + $0x30] sm:$0xff] }
 0x18a   :  { %2927 = vmatmul.mubr.msk.f32.vlgmr.msra.gmra.mrb[4].mxu1 %vm4809_vm3, %v349_v46  ;;  %v949_v46 = vld [vmem:[#allocation11 + $0x48] sm:$0xff] }
 0x18b   :  { %3021 = vmatpush1.bf16.msra.mxu1 %v3020_v45  ;;  %720 = vmatprep.mubr.f32.mxu1 %v3494_v1  ;;  %v3088_v45 = vpack.c.bf16 %v946_v44, %v944_v43  ;;  %v577_v43 = vld [vmem:[#allocation10 + $0xf0] sm:$0xff]  ;;  %v586_v44 = vld [vmem:[#allocation10 + $0x138] sm:$0xff] }
 0x18c   :  { %3023 = vmatprep.subr.bf16.mxu1 %v3022_v47  ;;  %v951_v47 = vld [vmem:[#allocation11 + $0x58] sm:$0xff] }
 0x18d   :  { %v3090_v48 = vpack.c.bf16 %v951_v47, %v949_v46 }
 0x18f   :  { %3025 = vmatpush1.bf16.msra.mxu1 %v3024_v52  ;;  %v953_v52 = vld [vmem:[#allocation11 + $0x68] sm:$0xff] }
 0x190   :  { %3027 = vmatprep.subr.bf16.mxu1 %v3026_v53  ;;  %v955_v53 = vld [vmem:[#allocation11 + $0x78] sm:$0xff] }
 0x191   :  { %v3094_v54 = vpack.c.bf16 %v955_v53, %v953_v52 }
 0x193   :  { %3029 = vmatpush1.bf16.msra.mxu1 %v3028_v58  ;;  %v2675_v58 = vld [vmem:[%s4785_s8] ss:$0 sm:$0xff] }
 0x194   :  { %3031 = vmatprep.subr.bf16.mxu1 %v3030_v59 }
 0x197   :  { %3033 = vmatpush1.bf16.msra.mxu1 %v3032_v3  ;;  %v566_v3 = vld [vmem:[#allocation10 + $0x98] sm:$0xff] }
 0x198   :  { %3051 = vmatprep.subr.bf16.mxu1 %v3050_v5  ;;  %v613_v5 = vlaneseq  ;;  %v3038_v9 = vpack.c.bf16 %v574_v4, %v566_v3 }
 0x19a   :  { %2681 = vmatmul.mubr.msk.f32.vlgmr.msra.gmra.mrb[6].mxu1 %vm4809_vm3, %v3744_v11  ;;  %v3757_v15 = vshrl.u32 %v613_v5, 7 }
 0x19b   :  { %3053 = vmatpush1.bf16.msra.mxu1 %v3052_v10  ;;  %862 = vmatprep.mubr.f32.mxu1 %v3494_v1  ;;  %v565_v10 = vld [vmem:[#allocation10 + $0x90] sm:$0xff] }
 0x19c   :  { %3055 = vmatprep.subr.bf16.mxu1 %v3054_v12  ;;  %v573_v12 = vld [vmem:[#allocation10 + $0xd0] sm:$0xff]  ;;  %v3762_v20 = vsub.s32 1, %v3757_v15  ;;  %v3795_v3 = vsub.s32 0, %v3757_v15 }
 0x19d   :  { %v3040_v16 = vpack.c.bf16 %v573_v12, %v565_v10  ;;  %v1129_v10 = vadd.s32 152, %v3757_v15  ;;  %v3828_v12 = vadd.s32 16, %v3757_v15 }
 0x19f   :  { %3057 = vmatpush1.bf16.msra.mxu1 %v3056_v17  ;;  %v3042_v17 = vpack.c.bf16 %v590_v14, %v582_v13  ;;  %v3837_v13 = vadd.s32 24, %v3757_v15  ;;  %v1130_v14 = vadd.s32 160, %v3757_v15 }
 0x1a0   :  { %3059 = vmatprep.subr.bf16.mxu1 %v3058_v18  ;;  %v581_v18 = vld [vmem:[#allocation10 + $0x110] sm:$0xff] }
 0x1a3   :  { %3061 = vmatpush1.bf16.msra.mxu1 %v3060_v23  ;;  %v3767_v23 = vld [vmem:[%s4789_s12] sm:$0xff] }
 0x1a4   :  { %3063 = vmatprep.subr.bf16.mxu1 %v3062_v24  ;;  %v3044_v24 = vpack.c.bf16 %v589_v19, %v581_v18  ;;  %v620_v28 = vrot.slane %v3767_v23, %v3762_v20  ;;  %v1131_v18 = vadd.s32 168, %v3757_v15  ;;  %v3857_v19 = vadd.s32 32, %v3757_v15 }
 0x1a7   :  { %3065 = vmatpush1.bf16.msra.mxu1 %v3064_v27  ;;  %v605_v27 = vld [vmem:[#allocation10 + $0x1d0] sm:$0xff] }
 0x1a8   :  { %3083 = vmatprep.subr.bf16.mxu1 %v3082_v33  ;;  %v3048_v32 = vpack.c.bf16 %v605_v27, %v597_v26  ;;  %v4853_v27 = vmov 0 }
 0x1aa   :  { %2683 = vmatmul.mubr.msk.f32.vlgmr.msra.gmra.mrb[8].mxu1 %vm4809_vm3, %v3744_v11 }
 0x1ab   :  { %1026 = vmatprep.mubr.f32.mxu1 %v3494_v1  ;;  %3085 = vmatpush1.bf16.msra.mxu1 %v3084_v39  ;;  %v578_v39 = vld [vmem:[#allocation10 + $0xf8] sm:$0xff] }
 0x1ac   :  { %3087 = vmatprep.subr.bf16.mxu1 %v3086_v42  ;;  %v3070_v41 = vpack.c.bf16 %v578_v39, %v570_v38  ;;  %v569_v42 = vld [vmem:[#allocation10 + $0xb0] sm:$0xff]  ;;  %v4863_v38 = vmov 0  ;;  %v3950_v39 = vadd.s32 56, %v3757_v15 }
 0x1ad   :  { %v3072_v46 = vpack.c.bf16 %v577_v43, %v569_v42  ;;  %v4871_v42 = vmov 0  ;;  %v1135_v43 = vadd.s32 200, %v3757_v15 }
 0x1af   :  { %3089 = vmatpush1.bf16.msra.mxu1 %v3088_v45  ;;  %v594_v45 = vld [vmem:[#allocation10 + $0x178] sm:$0xff] }
 0x1b0   :  { %3091 = vmatprep.subr.bf16.mxu1 %v3090_v48  ;;  %v3074_v47 = vpack.c.bf16 %v594_v45, %v586_v44  ;;  %v585_v48 = vld [vmem:[#allocation10 + $0x130] sm:$0xff]  ;;  %v3495_v45 = vmov 1.0|1.0  }
 0x1b1   :  { %v3076_v52 = vpack.c.bf16 %v593_v49, %v585_v48  ;;  %v4883_v48 = vmov 0 }
 0x1b3   :  { %3093 = vmatpush1.bf16.msra.mxu1 %v3092_v51  ;;  %v610_v51 = vld [vmem:[#allocation10 + $0x1f8] sm:$0xff] }
 0x1b4   :  { %3095 = vmatprep.subr.bf16.mxu1 %v3094_v54  ;;  %v3078_v53 = vpack.c.bf16 %v610_v51, %v602_v50  ;;  %v601_v54 = vld [vmem:[#allocation10 + $0x1b0] sm:$0xff]  ;;  %v4885_v50 = vmov 0  ;;  %v1118_v51 = vadd.s32 64, %v3757_v15 }
 0x1b7   :  { %3097 = vmatpush1.bf16.msra.mxu1 %v3096_v57  ;;  %v3080_v57 = vpack.c.bf16 %v609_v55, %v601_v54  ;;  %v4890_v54 = vmov 0  ;;  %v1136_v55 = vadd.s32 208, %v3757_v15 }
 0x25d   :  { %v2928_v59 = vpop.f32.mrb[4].mxu1 }
 0x25e   :  { %v444_v60 = vadd.f32 %v2928_v59, %v2675_v58  ;;  %v438_v61 = vpop.f32.mrb[5].mxu1  ;;  %v3784_v59 = vand.u32 127, %v613_v5  ;;  %v3807_v5 = vadd.s32 8, %v3757_v15 }
 0x25f   :  { %v439_v2 = vadd.f32 %v2675_v58, %v438_v61  ;;  %v1126_v61 = vadd.s32 128, %v3757_v15 }
 0x260   :  { %v448_v8 = vmax.f32 %v444_v60, 0.0  ;;  %v1083_v60 = vadd.s32 1, %v3784_v59  ;;  %v3789_v62 = vmul.u32 64, %v3784_v59 }
 0x261   :  { %v447_v6 = vmax.f32 %v439_v2, 0.0  ;;  %v1127_v2 = vadd.s32 136, %v3757_v15 }
 0x262   :  { %v3791_v63 = vmul.u32 64, %v1083_v60  ;;  %vm1159_vm4 = vcmp.ge.s32.totalorder %v1126_v61, %v3789_v62  ;;  %v3804_v4 = vmul.u32 8, %v1083_v60  ;;  %vm1143_vm11 = vcmp.ge.s32.totalorder %v3757_v15, %v3789_v62 }
 0x263   :  { %2945 = vmatprep.mubr.msk.f32.mxu0 %vm4809_vm3, %v447_v6  ;;  %vm1160_vm6 = vcmp.ge.s32.totalorder %v1127_v2, %v3789_v62  ;;  %vm1144_vm14 = vcmp.ge.s32.totalorder %v3807_v5, %v3789_v62  ;;  %vm1162_vm0 = vcmp.ge.s32.totalorder %v1129_v10, %v3789_v62  ;;  %vm1145_vm2 = vcmp.ge.s32.totalorder %v3828_v12, %v3789_v62 }
 0x264   :  { %2946 = vmatmul.mubr.msk.f32.vlgmr.msra.gmra.mrb[0].mxu0 %vm4809_vm3, %v448_v8  ;;  %vm1192_vm5 = vcmp.lt.s32.totalorder %v1126_v61, %v3791_v63  ;;  %vm1193_vm7 = vcmp.lt.s32.totalorder %v1127_v2, %v3791_v63  ;;  %v616_v8 = vrot.slane %v3767_v23, %v3795_v3  ;;  %vm1176_vm12 = vcmp.lt.s32.totalorder %v3757_v15, %v3791_v63 }
 0x265   :  { %3037 = vmatpush1.bf16.msra.mxu0 %v3036_v7  ;;  %791 = vmatprep.mubr.f32.mxu0 %v3494_v1  ;;  %vm3809_vm8 = vmand %vm1159_vm4, %vm1192_vm5  ;;  %v1128_v7 = vadd.s32 144, %v3757_v15  ;;  %vm1085_vm13 = vcmp.lt.s32.totalorder %v3757_v15, %v3804_v4  ;;  %vm1177_vm15 = vcmp.lt.s32.totalorder %v3807_v5, %v3791_v63  ;;  %vm1195_vm1 = vcmp.lt.s32.totalorder %v1129_v10, %v3791_v63 }
 0x266   :  { %3039 = vmatprep.subr.bf16.mxu0 %v3038_v9  ;;  %vm3816_vm9 = vmand %vm1160_vm6, %vm1193_vm7  ;;  %vm1178_vm4 = vcmp.lt.s32.totalorder %v3828_v12, %v3791_v63  ;;  %v1137_v60 = vadd.s32 216, %v3757_v15  ;;  %v1120_v61 = vadd.s32 80, %v3757_v15  ;;  %v1121_v6 = vadd.s32 88, %v3757_v15 }
 0x267   :  { %vm1161_vm5 = vcmp.ge.s32.totalorder %v1128_v7, %v3789_v62  ;;  %vm1194_vm6 = vcmp.lt.s32.totalorder %v1128_v7, %v3791_v63  ;;  %vm3849_vm7 = vmand %vm1143_vm11, %vm1176_vm12  ;;  %v4906_v9 = vmov 0  ;;  %v4911_v10 = vmov 0 }
 0x268   :  { %vm3872_vm12 = vmand %vm1144_vm14, %vm1177_vm15 }
 0x269   :  { %3041 = vmatpush1.bf16.msra.mxu0 %v3040_v16  ;;  %v2678_v16 = vld [vmem:[%s4787_s10] ss:$0 sm:$0xff]  ;;  %vm3900_vm15 = vmand %vm1162_vm0, %vm1195_vm1  ;;  %vm1180_vm0 = vcmp.lt.s32.totalorder %v3857_v19, %v3791_v63  ;;  %vm4867_vm1 = vcmp.ge.s32.totalorder %v1131_v18, %v3789_v62 }
 0x26a   :  { %3043 = vmatprep.subr.bf16.mxu0 %v3042_v17  ;;  %v4847_v17 = vmov 0  ;;  %v4856_v30 = vsel %vm3900_vm15, 4294967295, %v4855_v30 }
 0x26b   :  { %v4848_v17 = vsel %vm3849_vm7, 4294967295, %v4847_v17  ;;  %vm4865_vm7 = vcmask 523264  }
 0x26d   :  { %v3771_v31 = vpop.f32.mrb[6].mxu1  ;;  %3045 = vmatpush1.bf16.msra.mxu0 %v3044_v24  ;;  %v4851_v24 = vmov 0 }
 0x26e   :  { %v724_v33 = vpop.f32.mrb[7].mxu1  ;;  %3047 = vmatprep.subr.bf16.mxu0 %v3046_v25  ;;  %v4852_v24 = vsel %vm3872_vm12, 4294967295, %v4851_v24  ;;  %v723_v25 = vadd.f32 %v3771_v31, %v616_v8  ;;  %v1132_v31 = vadd.s32 176, %v3757_v15  ;;  %vm4866_vm12 = vcmp.lt.s32.totalorder %v1131_v18, %v3791_v63 }
 0x26f   :  { %v725_v37 = vadd.f32 %v724_v33, %v620_v28  ;;  %v3894_v28 = vadd.s32 40, %v3757_v15  ;;  %v1133_v33 = vadd.s32 184, %v3757_v15  ;;  %v4901_v8 = vmov 0 }
 0x270   :  { %v4915_v18 = vmov 0 }
 0x271   :  { %3049 = vmatpush1.bf16.msra.mxu0 %v3048_v32  ;;  %1476 = vmatprep.subr.mxu1 %v725_v37  ;;  %v4857_v32 = vmov 0  ;;  %v3933_v37 = vadd.s32 48, %v3757_v15  ;;  %vm4882_vm15 = vcmp.ge.s32.totalorder %v1133_v33, %v3789_v62 }
 0x272   :  { %3067 = vmatprep.subr.bf16.mxu0 %v3066_v34 }
 0x274   :  { %2682 = vmatmul.mubr.msk.f32.vlgmr.msra.gmra.mrb[2].mxu0 %vm4809_vm3, %v3744_v11 }
 0x275   :  { %3069 = vmatpush1.bf16.msra.mxu0 %v3068_v40  ;;  %933 = vmatprep.mubr.f32.mxu0 %v3494_v1  ;;  %v4868_v40 = vmov 0 }
 0x276   :  { %3071 = vmatprep.subr.bf16.mxu0 %v3070_v41  ;;  %v1134_v41 = vadd.s32 192, %v3757_v15 }
 0x279   :  { %3073 = vmatpush1.bf16.msra.mxu0 %v3072_v46  ;;  %v4875_v46 = vmov 0 }
 0x27a   :  { %3075 = vmatprep.subr.bf16.mxu0 %v3074_v47  ;;  %v4879_v47 = vmov 0 }
 0x27d   :  { %v3776_v56 = vpop.f32.mrb[8].mxu1  ;;  %3077 = vmatpush1.bf16.msra.mxu0 %v3076_v52  ;;  %v4888_v52 = vmov 0 }
 0x27e   :  { %v3778_v58 = vpop.f32.mrb[9].mxu1  ;;  %3079 = vmatprep.subr.bf16.mxu0 %v3078_v53  ;;  %v1119_v53 = vadd.s32 72, %v3757_v15 }
 0x281   :  { %3081 = vmatpush1.bf16.msra.mxu0 %v3080_v57  ;;  %v4893_v57 = vmov 0 }
 0x284   :  { %2684 = vmatmul.mubr.msk.f32.vlgmr.msra.gmra.mrb[4].mxu0 %vm4809_vm3, %v3744_v11  ;;  %v3802_v11 = vmul.u32 8, %v3784_v59  ;;  %vm3907_vm3 = vmand %vm1145_vm2, %vm1178_vm4  ;;  %vm4859_vm2 = vcmp.lt.s32.totalorder %v3837_v13, %v3791_v63  ;;  %vm4860_vm4 = vcmp.ge.s32.totalorder %v3837_v13, %v3789_v62 }
 0x285   :  { %1371 = vmatprep.mubr.f32.mxu0 %v3494_v1  ;;  %v4858_v32 = vsel %vm3907_vm3, 4294967295, %v4857_v32 }
 0x286   :  { %vm1075_vm10 = vcmp.ge.s32.totalorder %v3757_v15, %v3802_v11 }
 0x287   :  { %vm3865_vm11 = vmand %vm1075_vm10, %vm1085_vm13 }
 0x288   :  { %vm3885_vm10 = vmand %vm1161_vm5, %vm1194_vm6  ;;  %vm1163_vm5 = vcmp.ge.s32.totalorder %v1130_v14, %v3789_v62  ;;  %vm1196_vm6 = vcmp.lt.s32.totalorder %v1130_v14, %v3791_v63  ;;  %v1101_v49 = vsel %vm3865_vm11, 1.0, %v3494_v1  ;;  %v1138_v14 = vadd.s32 224, %v3757_v15 }
 0x289   :  { %v4854_v27 = vsel %vm3885_vm10, 4294967295, %v4853_v27  ;;  %vm3926_vm13 = vmand %vm4860_vm4, %vm4859_vm2  ;;  %vm1181_vm4 = vcmp.lt.s32.totalorder %v3894_v28, %v3791_v63 }
 0x28a   :  { %v4862_v36 = vsel %vm3926_vm13, 4294967295, %v4861_v36  ;;  %vm3941_vm14 = vmand %vm1163_vm5, %vm1196_vm6  ;;  %vm1149_vm6 = vcmp.ge.s32.totalorder %v3933_v37, %v3789_v62  ;;  %vm4881_vm13 = vcmask 523264  }
 0x28b   :  { %v4864_v38 = vsel %vm3941_vm14, 4294967295, %v4863_v38  ;;  %vm3957_vm10 = vmand %vm4867_vm1, %vm4866_vm12  ;;  %vm1199_vm1 = vcmp.lt.s32.totalorder %v1133_v33, %v3791_v63  ;;  %v1125_v33 = vadd.s32 120, %v3757_v15 }
 0x28c   :  { %v4869_v40 = vsel %vm3957_vm10, 4294967295, %v4868_v40  ;;  %vm4873_vm5 = vmpackc.low %vm3816_vm9, %vm3809_vm8  ;;  %vm1182_vm8 = vcmp.lt.s32.totalorder %v3933_v37, %v3791_v63  ;;  %vm1167_vm9 = vcmp.ge.s32.totalorder %v1134_v41, %v3789_v62 }
 0x337   :  { %v2947_v21 = vpop.f32.mrb[0].mxu0 }
 0x338   :  { %v536_v26 = vpop.f32.mrb[1].mxu0  ;;  %v542_v34 = vadd.f32 %v2947_v21, %v2678_v16  ;;  %v1122_v21 = vadd.s32 96, %v3757_v15 }
 0x339   :  { %v537_v29 = vadd.f32 %v2678_v16, %v536_v26  ;;  %v4913_v16 = vmov 0  ;;  %v1141_v26 = vadd.s32 248, %v3757_v15 }
 0x33a   :  { %v546_v44 = vmax.f32 %v542_v34, 0.0 }
 0x33b   :  { %v545_v35 = vmax.f32 %v537_v29, 0.0 }
 0x33d   :  { %2685 = vmatmul.mubr.msk.f32.vlgmr.msra.gmra.mrb[10].mxu1 %vm4865_vm7, %v545_v35  ;;  %vm4870_vm7 = vcmp.ge.s32.totalorder %v3857_v19, %v3789_v62 }
 0x33e   :  { %1477 = vmatpush1.msra.mxu1 %v723_v25  ;;  %1032 = vmatprep.mubr.f32.mxu1 %v3494_v1  ;;  %vm3968_vm2 = vmand %vm4870_vm7, %vm1180_vm0  ;;  %vm4874_vm7 = vcmp.ge.s32.totalorder %v3894_v28, %v3789_v62  ;;  %vm4878_vm0 = vcmp.ge.s32.totalorder %v1132_v31, %v3789_v62  ;;  %v1140_v25 = vadd.s32 240, %v3757_v15 }
 0x33f   :  { %v4872_v42 = vsel %vm3968_vm2, 4294967295, %v4871_v42  ;;  %3103 = vmatprep.subr.msk.bf16.mxu1 %vm4873_vm5, %v3495_v45  ;;  %vm3991_vm12 = vmand %vm4874_vm7, %vm1181_vm4  ;;  %vm4877_vm5 = vcmp.lt.s32.totalorder %v1132_v31, %v3791_v63  ;;  %vm1150_vm4 = vcmp.ge.s32.totalorder %v3950_v39, %v3789_v62  ;;  %vm1183_vm7 = vcmp.lt.s32.totalorder %v3950_v39, %v3791_v63 }
 0x340   :  { %v4876_v46 = vsel %vm3991_vm12, 4294967295, %v4875_v46  ;;  %vm4007_vm3 = vmand %vm4878_vm0, %vm4877_vm5  ;;  %vm1200_vm0 = vcmp.lt.s32.totalorder %v1134_v41, %v3791_v63  ;;  %v1124_v31 = vadd.s32 112, %v3757_v15 }
 0x341   :  { %v4880_v47 = vsel %vm4007_vm3, 4294967295, %v4879_v47  ;;  %2686 = vmatmul.mubr.msk.f32.gmra.mrb[12].mxu1 %vm4881_vm13, %v546_v44  ;;  %vm4018_vm12 = vmand %vm4882_vm15, %vm1199_vm1  ;;  %vm1168_vm13 = vcmp.ge.s32.totalorder %v1135_v43, %v3789_v62  ;;  %vm1201_vm15 = vcmp.lt.s32.totalorder %v1135_v43, %v3791_v63 }
 0x342   :  { %v4884_v48 = vsel %vm4018_vm12, 4294967295, %v4883_v48  ;;  %1540 = vmatprep.mubr.f32.mxu1 %v3494_v1  ;;  %vm4028_vm5 = vmand %vm1149_vm6, %vm1182_vm8  ;;  %vm4892_vm6 = vcmask 64512   ;;  %vm4904_vm12 = vnez %v4858_v32 }
 0x343   :  { %v4886_v50 = vsel %vm4028_vm5, 4294967295, %v4885_v50  ;;  %vm4039_vm10 = vmand %vm1150_vm4, %vm1183_vm7  ;;  %vm4895_vm4 = vnez %v4852_v24  ;;  %vm4896_vm7 = vnez %v4848_v17  ;;  %vm1203_vm5 = vcmp.lt.s32.totalorder %v1137_v60, %v3791_v63 }
 0x344   :  { %v4889_v52 = vsel %vm4039_vm10, 4294967295, %v4888_v52  ;;  %vm4044_vm11 = vmand %vm1167_vm9, %vm1200_vm0  ;;  %vm1151_vm0 = vcmp.ge.s32.totalorder %v1118_v51, %v3789_v62  ;;  %vm1185_vm9 = vcmp.lt.s32.totalorder %v1119_v53, %v3791_v63  ;;  %vm4903_vm10 = vnez %v4862_v36 }
 0x345   :  { %v4891_v54 = vsel %vm4044_vm11, 4294967295, %v4890_v54  ;;  %2695 = vmatmul.mubr.msk.f32.vlgmr.msra.gmra.mrb[14].mxu1 %vm4892_vm6, %v1101_v49  ;;  %vm4050_vm8 = vmand %vm1168_vm13, %vm1201_vm15  ;;  %vm1184_vm13 = vcmp.lt.s32.totalorder %v1118_v51, %v3791_v63  ;;  %vm4898_vm15 = vnez %v4856_v30  ;;  %vm4908_vm11 = vnez %v4869_v40 }
 0x346   :  { %v4894_v57 = vsel %vm4050_vm8, 4294967295, %v4893_v57  ;;  %vm4897_vm14 = vmpackc.low %vm4895_vm4, %vm4896_vm7  ;;  %1546 = vmatprep.mubr.f32.mxu1 %v3494_v1  ;;  %vm1152_vm7 = vcmp.ge.s32.totalorder %v1119_v53, %v3789_v62  ;;  %vm1170_vm4 = vcmp.ge.s32.totalorder %v1137_v60, %v3789_v62  ;;  %vm4909_vm8 = vnez %v4864_v38 }
 0x347   :  { %3105 = vmatpush3.bf16.msk.msra.mxu1 %vm4897_vm14, %v3495_v45  ;;  %v4069_v2 = vpop.f32.mrb[2].mxu0  ;;  %vm4899_vm14 = vnez %v4854_v27  ;;  %vm4905_vm2 = vmpackc.low %vm4903_vm10, %vm4904_vm12  ;;  %vm1154_vm10 = vcmp.ge.s32.totalorder %v1121_v6, %v3789_v62  ;;  %v1139_v17 = vadd.s32 232, %v3757_v15  ;;  %v1123_v24 = vadd.s32 104, %v3757_v15 }
 0x348   :  { %vm4900_vm6 = vmpackc.low %vm4898_vm15, %vm4899_vm14  ;;  %v4084_v7 = vpop.f32.mrb[3].mxu0  ;;  %vm1169_vm15 = vcmp.ge.s32.totalorder %v1136_v55, %v3789_v62  ;;  %vm1202_vm14 = vcmp.lt.s32.totalorder %v1136_v55, %v3791_v63  ;;  %v635_v36 = vsub.s32 5, %v3757_v15  ;;  %v623_v51 = vsub.s32 2, %v3757_v15 }
 0x349   :  { %3107 = vmatprep.subr.msk.bf16.mxu1 %vm4900_vm6, %v3495_v45  ;;  %vm4092_vm6 = vmand %vm1151_vm0, %vm1184_vm13  ;;  %vm1153_vm0 = vcmp.ge.s32.totalorder %v1120_v61, %v3789_v62  ;;  %vm1186_vm13 = vcmp.lt.s32.totalorder %v1120_v61, %v3791_v63 }
 0x34a   :  { %v4902_v8 = vsel %vm4092_vm6, 4294967295, %v4901_v8  ;;  %vm4104_vm3 = vmand %vm1152_vm7, %vm1185_vm9  ;;  %v624_v60 = vrot.slane %v3767_v23, %v623_v51 }
 0x34b   :  { %3109 = vmatpush3.bf16.msk.msra.mxu1 %vm4905_vm2, %v3495_v45  ;;  %v4907_v9 = vsel %vm4104_vm3, 4294967295, %v4906_v9  ;;  %vm4910_vm6 = vmpackc.low %vm4908_vm11, %vm4909_vm8  ;;  %vm1187_vm2 = vcmp.lt.s32.totalorder %v1121_v6, %v3791_v63  ;;  %vm4917_vm11 = vnez %v4876_v46  ;;  %vm4918_vm8 = vnez %v4872_v42 }
 0x34c   :  { %3111 = vmatprep.subr.msk.bf16.mxu1 %vm4910_vm6, %v3495_v45  ;;  %vm4116_vm1 = vmand %vm1169_vm15, %vm1202_vm14  ;;  %vm1189_vm6 = vcmp.lt.s32.totalorder %v1123_v24, %v3791_v63 }
 0x34d   :  { %v4912_v10 = vsel %vm4116_vm1, 4294967295, %v4911_v10  ;;  %vm4123_vm12 = vmand %vm1170_vm4, %vm1203_vm5  ;;  %vm4922_vm5 = vnez %v4884_v48  ;;  %vm4923_vm4 = vnez %v4880_v47  ;;  %v1039_v47 = vld [vmem:[%s4959_s16] sm:$0x1] }
 0x34e   :  { %v4914_v16 = vsel %vm4123_vm12, 4294967295, %v4913_v16  ;;  %vm4128_vm9 = vmand %vm1153_vm0, %vm1186_vm13  ;;  %vm1171_vm13 = vcmp.ge.s32.totalorder %v1138_v14, %v3789_v62  ;;  %vm1156_vm12 = vcmp.ge.s32.totalorder %v1123_v24, %v3789_v62 }
 0x34f   :  { %v4916_v18 = vsel %vm4128_vm9, 4294967295, %v4915_v18  ;;  %vm4919_vm7 = vmpackc.low %vm4917_vm11, %vm4918_vm8  ;;  %vm1172_vm11 = vcmp.ge.s32.totalorder %v1139_v17, %v3789_v62  ;;  %vm1205_vm8 = vcmp.lt.s32.totalorder %v1139_v17, %v3791_v63  ;;  %vm4932_vm9 = vnez %v4891_v54 }
 0x350   :  { %3113 = vmatpush3.bf16.msk.msra.mxu1 %vm4919_vm7, %v3495_v45  ;;  %vm4139_vm15 = vmand %vm1154_vm10, %vm1187_vm2  ;;  %vm1204_vm10 = vcmp.lt.s32.totalorder %v1138_v14, %v3791_v63  ;;  %vm4927_vm2 = vnez %v4886_v50  ;;  %vm4931_vm7 = vnez %v4894_v57 }
 0x351   :  { %v4921_v22 = vsel %vm4139_vm15, 4294967295, %v4920_v22  ;;  %vm4924_vm14 = vmpackc.low %vm4922_vm5, %vm4923_vm4  ;;  %vm1155_vm5 = vcmp.ge.s32.totalorder %v1122_v21, %v3789_v62  ;;  %vm1188_vm4 = vcmp.lt.s32.totalorder %v1122_v21, %v3791_v63 }
 0x352   :  { %3115 = vmatprep.subr.msk.bf16.mxu1 %vm4924_vm14, %v3495_v45  ;;  %vm4926_vm14 = vnez %v4889_v52  ;;  %vm4176_vm1 = vmand %vm1171_vm13, %vm1204_vm10  ;;  %vm1206_vm13 = vcmp.lt.s32.totalorder %v1140_v25, %v3791_v63 }
 0x353   :  { %vm4928_vm0 = vmpackc.low %vm4926_vm14, %vm4927_vm2  ;;  %vm1174_vm2 = vcmp.ge.s32.totalorder %v1141_v26, %v3789_v62  ;;  %vm1207_vm14 = vcmp.lt.s32.totalorder %v1141_v26, %v3791_v63 }
 0x354   :  { %3117 = vmatpush3.bf16.msk.msra.mxu1 %vm4928_vm0, %v3495_v45  ;;  %vm4933_vm15 = vmpackc.low %vm4931_vm7, %vm4932_vm9  ;;  %vm1173_vm0 = vcmp.ge.s32.totalorder %v1140_v25, %v3789_v62 }
 0x355   :  { %3119 = vmatprep.subr.msk.bf16.mxu1 %vm4933_vm15, %v3495_v45  ;;  %vm4188_vm3 = vmand %vm1172_vm11, %vm1205_vm8  ;;  %vm4940_vm15 = vnez %v4907_v9  ;;  %vm4941_vm11 = vnez %v4902_v8  ;;  %v794_v8 = vadd.f32 %v4069_v2, %v624_v60 }
 0x356   :  { %vm4194_vm10 = vmand %vm1155_vm5, %vm1188_vm4  ;;  %vm4945_vm5 = vnez %v4914_v16 }
 0x357   :  { %vm4201_vm9 = vmand %vm1156_vm12, %vm1189_vm6  ;;  %vm4946_vm12 = vnez %v4912_v10 }
 0x358   :  { %vm4942_vm8 = vmpackc.low %vm4940_vm15, %vm4941_vm11 }
 0x359   :  { %3121 = vmatpush3.bf16.msk.msra.mxu1 %vm4942_vm8, %v3495_v45  ;;  %vm4212_vm7 = vmand %vm1173_vm0, %vm1206_vm13  ;;  %vm1157_vm0 = vcmp.ge.s32.totalorder %v1124_v31, %v3789_v62  ;;  %vm1190_vm13 = vcmp.lt.s32.totalorder %v1124_v31, %v3791_v63  ;;  %vm4950_vm8 = vnez %v4921_v22 }
 0x35a   :  { %vm4947_vm6 = vmpackc.low %vm4945_vm5, %vm4946_vm12 }
 0x35b   :  { %3123 = vmatprep.subr.msk.bf16.mxu1 %vm4947_vm6, %v3495_v45  ;;  %vm4222_vm4 = vmand %vm1174_vm2, %vm1207_vm14  ;;  %vm1158_vm2 = vcmp.ge.s32.totalorder %v1125_v33, %v3789_v62  ;;  %vm1191_vm14 = vcmp.lt.s32.totalorder %v1125_v33, %v3791_v63  ;;  %v636_v62 = vrot.slane %v3767_v23, %v635_v36  ;;  %vm1076_vm6 = vcmp.ge.s32.totalorder %v3807_v5, %v3802_v11 }
 0x35c   :  { %vm3126_vm15 = vmpackc.low %vm4188_vm3, %vm4176_vm1  ;;  %vm4951_vm3 = vnez %v4916_v18 }
 0x35d   :  { %vm3128_vm11 = vmpackc.low %vm4201_vm9, %vm4194_vm10  ;;  %v867_v63 = vadd.f32 %v3778_v58, %v636_v62 }
 0x35e   :  { %vm4952_vm1 = vmpackc.low %vm4950_vm8, %vm4951_vm3  ;;  %vm1088_vm8 = vcmp.lt.s32.totalorder %v3837_v13, %v3804_v4 }
 0x35f   :  { %3125 = vmatpush3.bf16.msk.msra.mxu1 %vm4952_vm1, %v3495_v45  ;;  %vm3130_vm5 = vmpackc.low %vm4222_vm4, %vm4212_vm7  ;;  %vm1086_vm7 = vcmp.lt.s32.totalorder %v3807_v5, %v3804_v4 }
 0x360   :  { %3127 = vmatprep.subr.msk.bf16.mxu1 %vm3126_vm15, %v3495_v45  ;;  %vm1222_vm12 = vmand %vm1157_vm0, %vm1190_vm13  ;;  %vm4953_vm15 = vcmask 64512   ;;  %vm1077_vm0 = vcmp.ge.s32.totalorder %v3828_v12, %v3802_v11  ;;  %vm1087_vm13 = vcmp.lt.s32.totalorder %v3828_v12, %v3804_v4 }
 0x361   :  { %vm1223_vm10 = vmand %vm1158_vm2, %vm1191_vm14  ;;  %vm1078_vm14 = vcmp.ge.s32.totalorder %v3837_v13, %v3802_v11 }
 0x362   :  { %vm3132_vm9 = vmpackc.low %vm1223_vm10, %vm1222_vm12  ;;  %vm1089_vm12 = vcmp.lt.s32.totalorder %v3857_v19, %v3804_v4 }
 0x363   :  { %3129 = vmatpush3.bf16.msk.msra.mxu1 %vm3128_vm11, %v3495_v45  ;;  %vm1094_vm4 = vmand %vm1076_vm6, %vm1086_vm7  ;;  %vm1080_vm6 = vcmp.ge.s32.totalorder %v3894_v28, %v3802_v11  ;;  %vm1090_vm7 = vcmp.lt.s32.totalorder %v3894_v28, %v3804_v4 }
 0x364   :  { %3131 = vmatprep.subr.msk.bf16.mxu1 %vm3130_vm5, %v3495_v45  ;;  %v1102_v38 = vsel %vm1094_vm4, 1.0, %v3494_v1  ;;  %vm1095_vm11 = vmand %vm1077_vm0, %vm1087_vm13  ;;  %vm1079_vm5 = vcmp.ge.s32.totalorder %v3857_v19, %v3802_v11  ;;  %vm1081_vm0 = vcmp.ge.s32.totalorder %v3933_v37, %v3802_v11  ;;  %vm1091_vm13 = vcmp.lt.s32.totalorder %v3933_v37, %v3804_v4 }
 0x365   :  { %2696 = vmatmul.mubr.msk.f32.gmra.mrb[16].mxu1 %vm4953_vm15, %v1102_v38  ;;  %v1103_v58 = vsel %vm1095_vm11, 1.0, %v3494_v1  ;;  %vm4954_vm2 = vmmov %vm4953_vm15 }
 0x366   :  { %1552 = vmatprep.mubr.f32.mxu1 %v3494_v1  ;;  %vm1096_vm3 = vmand %vm1078_vm14, %vm1088_vm8  ;;  %vm1082_vm14 = vcmp.ge.s32.totalorder %v3950_v39, %v3802_v11  ;;  %vm1092_vm8 = vcmp.lt.s32.totalorder %v3950_v39, %v3804_v4  ;;  %v627_v11 = vsub.s32 3, %v3757_v15 }
 0x367   :  { %3133 = vmatpush3.bf16.msk.msra.mxu1 %vm3132_vm9, %v3495_v45  ;;  %v1104_v40 = vsel %vm1096_vm3, 1.0, %v3494_v1  ;;  %vm4955_vm1 = vmmov %vm4954_vm2  ;;  %v1040_v45 = vld [vmem:[%s4959_s16 + $0x1] sm:$0x1] }
 0x368   :  { %2187 = vmatprep.subr.mxu1 %v867_v63  ;;  %vm1097_vm10 = vmand %vm1079_vm5, %vm1089_vm12  ;;  %v1041_v46 = vmul.u32 8, %v1040_v45  ;;  %v628_v52 = vrot.slane %v3767_v23, %v627_v11 }
 0x369   :  { %2697 = vmatmul.mubr.msk.f32.gmra.mrb[18].mxu1 %vm4954_vm2, %v1103_v58  ;;  %v1105_v41 = vsel %vm1097_vm10, 1.0, %v3494_v1  ;;  %vm4956_vm9 = vmmov %vm4955_vm1  ;;  %vm4960_vm10 = vcmask 130048  }
 0x36a   :  { %1558 = vmatprep.mubr.f32.mxu1 %v3494_v1  ;;  %vm1098_vm4 = vmand %vm1080_vm6, %vm1090_vm7  ;;  %v1042_v48 = vadd.s32 %v1041_v46, %v1039_v47  ;;  %v796_v61 = vadd.f32 %v4084_v7, %v628_v52 }
 0x36b   :  { %v1106_v42 = vsel %vm1098_vm4, 1.0, %v3494_v1  ;;  %vm4957_vm15 = vmmov %vm4955_vm1 }
 0x36c   :  { %vm1099_vm11 = vmand %vm1081_vm0, %vm1091_vm13  ;;  %v1055_v4 = vrot.slane %v1042_v48, %v3795_v3 }
 0x36d   :  { %2698 = vmatmul.mubr.msk.f32.gmra.mrb[20].mxu1 %vm4955_vm1, %v1104_v40  ;;  %v1107_v43 = vsel %vm1099_vm11, 1.0, %v3494_v1  ;;  %vm4958_vm2 = vmmov %vm4955_vm1 }
 0x36e   :  { %1564 = vmatprep.mubr.f32.mxu1 %v3494_v1  ;;  %vm1100_vm3 = vmand %vm1082_vm14, %vm1092_vm8  ;;  %vm1056_vm5 = vcmp.eq.s32.totalorder %v3757_v15, %v1055_v4  ;;  %vm1057_vm12 = vcmp.eq.s32.totalorder %v3807_v5, %v1055_v4  ;;  %vm1059_vm7 = vcmp.eq.s32.totalorder %v3837_v13, %v1055_v4  ;;  %vm1061_vm13 = vcmp.eq.s32.totalorder %v3894_v28, %v1055_v4 }
 0x36f   :  { %v1108_v44 = vsel %vm1100_vm3, 1.0, %v3494_v1  ;;  %v4317_v6 = vsel %vm1056_vm5, 1.0, %v3494_v1  ;;  %v4325_v9 = vsel %vm1057_vm12, 1.0, %v3494_v1  ;;  %vm4961_vm6 = vmmov %vm4960_vm10  ;;  %v1067_v2 = vsel %vm1059_vm7, 1.0, %v3494_v1 }
 0x370   :  { %vm4962_vm4 = vmmov %vm4961_vm6  ;;  %v1069_v13 = vsel %vm1061_vm13, 1.0, %v3494_v1  ;;  %vm1063_vm8 = vcmp.eq.s32.totalorder %v3950_v39, %v1055_v4  ;;  %vm4968_vm12 = vcmask 64512  }
 0x371   :  { %2699 = vmatmul.mubr.msk.f32.gmra.mrb[22].mxu1 %vm4956_vm9, %v1105_v41  ;;  %vm1058_vm9 = vcmp.eq.s32.totalorder %v3828_v12, %v1055_v4  ;;  %vm4963_vm0 = vmmov %vm4962_vm4  ;;  %v1071_v28 = vsel %vm1063_vm8, 1.0, %v3494_v1 }
 0x372   :  { %1570 = vmatprep.mubr.f32.mxu1 %v3494_v1  ;;  %v1066_v5 = vsel %vm1058_vm9, 1.0, %v3494_v1  ;;  %vm4964_vm11 = vmmov %vm4963_vm0 }
 0x373   :  { %vm4965_vm14 = vmmov %vm4963_vm0 }
 0x374   :  { %vm4966_vm3 = vmmov %vm4963_vm0 }
 0x375   :  { %2700 = vmatmul.mubr.msk.f32.gmra.mrb[24].mxu1 %vm4957_vm15, %v1106_v42  ;;  %vm1060_vm15 = vcmp.eq.s32.totalorder %v3857_v19, %v1055_v4  ;;  %vm4967_vm5 = vmmov %vm4963_vm0 }
 0x376   :  { %1576 = vmatprep.mubr.f32.mxu1 %v3494_v1  ;;  %v1068_v12 = vsel %vm1060_vm15, 1.0, %v3494_v1  ;;  %vm4976_vm13 = vmmov %vm4966_vm3 }
 0x377   :  { %v1420_v32 = vsel %vm4976_vm13, %v4317_v6, 0.0 }
 0x378   :  { %1421 = vadd.xlane.f32.xlu0 %v1420_v32 }
 0x379   :  { %2701 = vmatmul.mubr.msk.f32.gmra.mrb[26].mxu1 %vm4958_vm2, %v1107_v43  ;;  %vm1062_vm2 = vcmp.eq.s32.totalorder %v3933_v37, %v1055_v4 }
 0x37a   :  { %1582 = vmatprep.mubr.f32.mxu1 %v3494_v1  ;;  %v1070_v19 = vsel %vm1062_vm2, 1.0, %v3494_v1  ;;  %vm4978_vm2 = vmmov %vm4966_vm3 }
 0x37b   :  { %v1423_v34 = vsel %vm4978_vm2, %v4325_v9, 0.0  ;;  %vm4980_vm8 = vmmov %vm4978_vm2 }
 0x37c   :  { %1424 = vadd.xlane.f32.xlu0 %v1423_v34  ;;  %v1432_v36 = vsel %vm4980_vm8, %v1068_v12, 0.0 }
 0x37d   :  { %2702 = vmatmul.mubr.msk.f32.gmra.mrb[28].mxu1 %vm4955_vm1, %v1108_v44  ;;  %vm1116_vm1 = vcmp.eq.s32.totalorder %v3757_v15, %v3784_v59 }
 0x37e   :  { %v4357_v37 = vsel %vm1116_vm1, 1.0, %v3494_v1  ;;  %vm4982_vm1 = vmmov %vm4978_vm2 }
 0x37f   :  { %v1438_v63 = vsel %vm4982_vm1, %v1070_v19, 0.0 }
 0x380   :  { %1433 = vadd.xlane.f32.xlu0 %v1432_v36 }
 0x384   :  { %1439 = vadd.xlane.f32.xlu0 %v1438_v63 }
 0x410   :  { %v1028_v49 = vpop.f32.mrb[10].mxu1 }
 0x411   :  { %v1030_v50 = vpop.f32.mrb[11].mxu1 }
 0x414   :  { %v1034_v53 = vpop.f32.mrb[12].mxu1 }
 0x415   :  { %v3100_v54 = vpack.c.bf16 %v1034_v53, %v1028_v49  ;;  %v1036_v55 = vpop.f32.mrb[13].mxu1  ;;  %v631_v53 = vsub.s32 4, %v3757_v15 }
 0x416   :  { %v3098_v57 = vpack.c.bf16 %v1036_v55, %v1030_v50 }
 0x417   :  { %v632_v60 = vrot.slane %v3767_v23, %v631_v53 }
 0x418   :  { %3099 = vmatprep.subr.bf16.mxu0 %v3098_v57  ;;  %v1542_v39 = vpop.f32.mrb[14].mxu1 }
 0x419   :  { %3101 = vmatpush1.bf16.msra.mxu0 %v3100_v54  ;;  %v1544_v7 = vpop.f32.mrb[15].mxu1 }
 0x41a   :  { %1592 = vmatprep.subr.mxu0 %v796_v61 }
 0x41c   :  { %2687 = vmatmul.mubr.msk.f32.vlgmr.msra.gmra.mrb[6].mxu0 %vm4960_vm10, %v4317_v6  ;;  %vm4969_vm10 = vmmov %vm4968_vm12 }
 0x41d   :  { %1593 = vmatpush1.msra.mxu0 %v794_v8  ;;  %1377 = vmatprep.mubr.f32.mxu0 %v3494_v1  ;;  %vm4970_vm9 = vmmov %vm4969_vm10 }
 0x420   :  { %2688 = vmatmul.mubr.msk.f32.gmra.mrb[8].mxu0 %vm4961_vm6, %v4325_v9  ;;  %vm4971_vm6 = vmmov %vm4970_vm9 }
 0x421   :  { %1383 = vmatprep.mubr.f32.mxu0 %v3494_v1  ;;  %vm4972_vm7 = vmmov %vm4971_vm6 }
 0x424   :  { %2689 = vmatmul.mubr.msk.f32.gmra.mrb[10].mxu0 %vm4962_vm4, %v1066_v5  ;;  %vm4973_vm4 = vmmov %vm4971_vm6 }
 0x425   :  { %1389 = vmatprep.mubr.f32.mxu0 %v3494_v1  ;;  %vm4974_vm15 = vmmov %vm4973_vm4 }
 0x428   :  { %2690 = vmatmul.mubr.msk.f32.gmra.mrb[12].mxu0 %vm4963_vm0, %v1067_v2  ;;  %vm4975_vm0 = vmmov %vm4973_vm4 }
 0x429   :  { %1395 = vmatprep.mubr.f32.mxu0 %v3494_v1 }
 0x42c   :  { %2691 = vmatmul.mubr.msk.f32.gmra.mrb[14].mxu0 %vm4964_vm11, %v1068_v12  ;;  %vm4977_vm11 = vmmov %vm4966_vm3  ;;  %v865_v12 = vadd.f32 %v3776_v56, %v632_v60 }
 0x42d   :  { %1401 = vmatprep.mubr.f32.mxu0 %v3494_v1  ;;  %v1426_v33 = vsel %vm4977_vm11, %v1066_v5, 0.0 }
 0x42e   :  { %1427 = vadd.xlane.f32.xlu1 %v1426_v33 }
 0x430   :  { %2692 = vmatmul.mubr.msk.f32.gmra.mrb[16].mxu0 %vm4965_vm14, %v1069_v13  ;;  %vm4979_vm14 = vmmov %vm4978_vm2 }
 0x431   :  { %1407 = vmatprep.mubr.f32.mxu0 %v3494_v1  ;;  %v1429_v35 = vsel %vm4979_vm14, %v1067_v2, 0.0 }
 0x432   :  { %1430 = vadd.xlane.f32.xlu1 %v1429_v35 }
 0x434   :  { %2693 = vmatmul.mubr.msk.f32.gmra.mrb[18].mxu0 %vm4966_vm3, %v1070_v19  ;;  %vm4981_vm3 = vmmov %vm4978_vm2 }
 0x435   :  { %1413 = vmatprep.mubr.f32.mxu0 %v3494_v1  ;;  %v1435_v62 = vsel %vm4981_vm3, %v1069_v13, 0.0  ;;  %vm2067_vm3 = vcmask 1043456  }
 0x436   :  { %1436 = vadd.xlane.f32.xlu1 %v1435_v62 }
 0x438   :  { %2694 = vmatmul.mubr.msk.f32.gmra.mrb[20].mxu0 %vm4967_vm5, %v1071_v28  ;;  %v1548_v10 = vpop.f32.mrb[16].mxu1  ;;  %vm4983_vm5 = vmmov %vm4982_vm1 }
 0x439   :  { %1656 = vmatprep.mubr.f32.mxu0 %v3494_v1  ;;  %v1550_v14 = vpop.f32.mrb[17].mxu1  ;;  %v1441_v38 = vsel %vm4983_vm5, %v1071_v28, 0.0 }
 0x43a   :  { %1442 = vadd.xlane.f32.xlu1 %v1441_v38 }
 0x43c   :  { %2703 = vmatmul.mubr.msk.f32.vlgmr.msra.gmra.mrb[22].mxu0 %vm4968_vm12, %v4357_v37  ;;  %v4383_v16 = vpop.f32.mrb[18].mxu1  ;;  %vm4984_vm12 = vmmov %vm4975_vm0 }
 0x43d   :  { %1662 = vmatprep.mubr.f32.mxu0 %v3494_v1  ;;  %v4385_v17 = vpop.f32.mrb[19].mxu1 }
 0x440   :  { %2704 = vmatmul.mubr.msk.f32.gmra.mrb[24].mxu0 %vm4969_vm10, %v4357_v37  ;;  %v4387_v18 = vpop.f32.mrb[20].mxu1  ;;  %vm4985_vm10 = vmmov %vm4975_vm0 }
 0x441   :  { %1668 = vmatprep.mubr.f32.mxu0 %v3494_v1  ;;  %v4389_v21 = vpop.f32.mrb[21].mxu1 }
 0x444   :  { %2705 = vmatmul.mubr.msk.f32.gmra.mrb[26].mxu0 %vm4970_vm9, %v4357_v37  ;;  %v4391_v22 = vpop.f32.mrb[22].mxu1  ;;  %vm4986_vm9 = vmmov %vm4975_vm0 }
 0x445   :  { %1674 = vmatprep.mubr.f32.mxu0 %v3494_v1  ;;  %v4393_v24 = vpop.f32.mrb[23].mxu1 }
 0x448   :  { %2706 = vmatmul.mubr.msk.f32.gmra.mrb[28].mxu0 %vm4971_vm6, %v4357_v37  ;;  %v4395_v25 = vpop.f32.mrb[24].mxu1  ;;  %vm4987_vm6 = vmmov %vm4975_vm0 }
 0x449   :  { %1680 = vmatprep.mubr.f32.mxu0 %v3494_v1  ;;  %v4397_v26 = vpop.f32.mrb[25].mxu1 }
 0x44c   :  { %2707 = vmatmul.mubr.msk.f32.gmra.mrb[30].mxu0 %vm4972_vm7, %v4357_v37  ;;  %v4399_v27 = vpop.f32.mrb[26].mxu1  ;;  %vm4988_vm7 = vmmov %vm4975_vm0 }
 0x44d   :  { %1686 = vmatprep.mubr.f32.mxu0 %v3494_v1  ;;  %v4401_v29 = vpop.f32.mrb[27].mxu1 }
 0x450   :  { %2708 = vmatmul.mubr.msk.f32.gmra.mrb[32].mxu0 %vm4973_vm4, %v4357_v37  ;;  %v4403_v30 = vpop.f32.mrb[28].mxu1  ;;  %vm4989_vm4 = vmmov %vm4975_vm0 }
 0x451   :  { %1692 = vmatprep.mubr.f32.mxu0 %v3494_v1  ;;  %v4405_v31 = vpop.f32.mrb[29].mxu1 }
 0x454   :  { %2709 = vmatmul.mubr.msk.f32.gmra.mrb[34].mxu0 %vm4974_vm15, %v4357_v37  ;;  %vm4990_vm15 = vmmov %vm4975_vm0 }
 0x455   :  { %1698 = vmatprep.mubr.f32.mxu0 %v3494_v1 }
 0x458   :  { %2710 = vmatmul.mubr.msk.f32.gmra.mrb[36].mxu0 %vm4975_vm0, %v4357_v37 }
 0x459   :  { %2138 = vmatprep.mubr.f32.mxu0 %v3494_v1 }
 0x4ef   :  { %v4417_v58 = vpop.f32.mrb[6].mxu0 }
 0x4f0   :  { %v4419_v40 = vpop.f32.mrb[7].mxu0 }
 0x4f3   :  { %v4421_v41 = vpop.f32.mrb[8].mxu0 }
 0x4f4   :  { %v4423_v42 = vpop.f32.mrb[9].mxu0 }
 0x4f7   :  { %v4425_v43 = vpop.f32.mrb[10].mxu0 }
 0x4f8   :  { %v4427_v44 = vpop.f32.mrb[11].mxu0 }
 0x4fb   :  { %v4429_v45 = vpop.f32.mrb[12].mxu0 }
 0x4fc   :  { %v4431_v46 = vpop.f32.mrb[13].mxu0 }
 0x4ff   :  { %v4433_v47 = vpop.f32.mrb[14].mxu0 }
 0x500   :  { %v4435_v48 = vpop.f32.mrb[15].mxu0 }
 0x503   :  { %v4437_v11 = vpop.f32.mrb[16].mxu0 }
 0x504   :  { %v4439_v49 = vpop.f32.mrb[17].mxu0 }
 0x507   :  { %v4441_v50 = vpop.f32.mrb[18].mxu0 }
 0x508   :  { %v4443_v4 = vpop.f32.mrb[19].mxu0 }
 0x50b   :  { %v4445_v51 = vpop.f32.mrb[20].mxu0 }
 0x50c   :  { %v4447_v52 = vpop.f32.mrb[21].mxu0 }
 0x50f   :  { %v1658_v54 = vpop.f32.mrb[22].mxu0 }
 0x510   :  { %v1659_v55 = vadd.f32 %v1658_v54, %v4417_v58  ;;  %v1660_v57 = vpop.f32.mrb[23].mxu0 }
 0x511   :  { %v1661_v61 = vadd.f32 %v1660_v57, %v4419_v40 }
 0x512   :  { %v1705_v6 = vmul.f32 %v1659_v55, %v1542_v39 }
 0x513   :  { %v1706_v8 = vmul.f32 %v1661_v61, %v1544_v7  ;;  %v1664_v9 = vpop.f32.mrb[24].mxu0 }
 0x514   :  { %v1665_v5 = vadd.f32 %v1664_v9, %v4421_v41  ;;  %v1666_v2 = vpop.f32.mrb[25].mxu0 }
 0x515   :  { %v1667_v13 = vadd.f32 %v1666_v2, %v4423_v42  ;;  %1785 = vmatprep.mubr.f32.mxu1 %v1706_v8 }
 0x516   :  { %v1707_v19 = vmul.f32 %v1665_v5, %v1548_v10  ;;  %1786 = vmatmul.mubr.f32.vlgmr.msra.gmra.mrb[30].mxu1 %v1705_v6 }
 0x517   :  { %v1708_v28 = vmul.f32 %v1667_v13, %v1550_v14  ;;  %2188 = vmatpush1.msra.mxu1 %v865_v12  ;;  %v1670_v32 = vpop.f32.mrb[26].mxu0 }
 0x518   :  { %v1671_v23 = vadd.f32 %v1670_v32, %v4425_v43  ;;  %v1672_v33 = vpop.f32.mrb[27].mxu0  ;;  %v4514_v32 = vpop.xlane.xlu0 %1421 }
 0x519   :  { %v1673_v39 = vadd.f32 %v1672_v33, %v4427_v44  ;;  %1790 = vmatprep.mubr.f32.mxu1 %v1708_v28  ;;  %vm1444_vm5 = vcmp.gt.f32.partialorder %v4514_v32, 0.0 }
 0x51a   :  { %v1709_v7 = vmul.f32 %v1671_v23, %v4383_v16  ;;  %1791 = vmatmul.mubr.f32.gmra.mrb[32].mxu1 %v1707_v19 }
 0x51b   :  { %v1710_v34 = vmul.f32 %v1673_v39, %v4385_v17  ;;  %v1676_v56 = vpop.f32.mrb[28].mxu0 }
 0x51c   :  { %v1677_v35 = vadd.f32 %v1676_v56, %v4429_v45  ;;  %v1678_v36 = vpop.f32.mrb[29].mxu0  ;;  %v4517_v56 = vpop.xlane.xlu0 %1424 }
 0x51d   :  { %v1679_v10 = vadd.f32 %v1678_v36, %v4431_v46  ;;  %1795 = vmatprep.mubr.f32.mxu1 %v1710_v34 }
 0x51e   :  { %v1711_v14 = vmul.f32 %v1677_v35, %v4387_v18  ;;  %1796 = vmatmul.mubr.f32.gmra.mrb[34].mxu1 %v1709_v7 }
 0x51f   :  { %v1712_v62 = vmul.f32 %v1679_v10, %v4389_v21  ;;  %v1682_v63 = vpop.f32.mrb[30].mxu0 }
 0x520   :  { %v1683_v38 = vadd.f32 %v1682_v63, %v4433_v47  ;;  %v1684_v53 = vpop.f32.mrb[31].mxu0 }
 0x521   :  { %v1685_v16 = vadd.f32 %v1684_v53, %v4435_v48  ;;  %1800 = vmatprep.mubr.f32.mxu1 %v1712_v62 }
 0x522   :  { %v1713_v17 = vmul.f32 %v1683_v38, %v4391_v22  ;;  %1801 = vmatmul.mubr.f32.gmra.mrb[36].mxu1 %v1711_v14  ;;  %v4521_v14 = vpop.xlane.xlu1 %1427 }
 0x523   :  { %v1714_v54 = vmul.f32 %v1685_v16, %v4393_v24  ;;  %v1688_v55 = vpop.f32.mrb[32].mxu0 }
 0x524   :  { %v1689_v57 = vadd.f32 %v1688_v55, %v4437_v11  ;;  %v1690_v60 = vpop.f32.mrb[33].mxu0 }
 0x525   :  { %v1691_v18 = vadd.f32 %v1690_v60, %v4439_v49  ;;  %1805 = vmatprep.mubr.f32.mxu1 %v1714_v54 }
 0x526   :  { %v1715_v21 = vmul.f32 %v1689_v57, %v4395_v25  ;;  %1806 = vmatmul.mubr.f32.gmra.mrb[38].mxu1 %v1713_v17 }
 0x527   :  { %v1716_v61 = vmul.f32 %v1691_v18, %v4397_v26  ;;  %v1694_v6 = vpop.f32.mrb[34].mxu0 }
 0x528   :  { %v1695_v8 = vadd.f32 %v1694_v6, %v4441_v50  ;;  %v1696_v9 = vpop.f32.mrb[35].mxu0  ;;  %v4532_v6 = vpop.xlane.xlu1 %1430 }
 0x529   :  { %v1697_v22 = vadd.f32 %v1696_v9, %v4443_v4  ;;  %1810 = vmatprep.mubr.f32.mxu1 %v1716_v61 }
 0x52a   :  { %v1717_v24 = vmul.f32 %v1695_v8, %v4399_v27  ;;  %1811 = vmatmul.mubr.f32.gmra.mrb[40].mxu1 %v1715_v21  ;;  %v4505_v27 = vadd.s32 1, %v3757_v15 }
 0x52b   :  { %v1718_v5 = vmul.f32 %v1697_v22, %v4401_v29  ;;  %v1700_v2 = vpop.f32.mrb[36].mxu0  ;;  %v1272_v29 = vadd.s32 128, %v3784_v59 }
 0x52c   :  { %v1701_v12 = vadd.f32 %v1700_v2, %v4445_v51  ;;  %v1702_v13 = vpop.f32.mrb[37].mxu0 }
 0x52d   :  { %v1703_v25 = vadd.f32 %v1702_v13, %v4447_v52  ;;  %1815 = vmatprep.mubr.f32.mxu1 %v1718_v5 }
 0x52e   :  { %v1719_v26 = vmul.f32 %v1701_v12, %v4403_v30  ;;  %1816 = vmatmul.mubr.f32.gmra.mrb[42].mxu1 %v1717_v24  ;;  %v1273_v30 = vmul.u32 64, %v3757_v15 }
 0x52f   :  { %v1720_v19 = vmul.f32 %v1703_v25, %v4405_v31  ;;  %v1276_v31 = vmul.u32 64, %v4505_v27 }
 0x530   :  { %vm1275_vm13 = vcmp.ge.s32.totalorder %v1272_v29, %v1273_v30  ;;  %vm1274_vm14 = vcmp.ge.s32.totalorder %v3784_v59, %v1273_v30 }
 0x531   :  { %1820 = vmatprep.mubr.f32.mxu1 %v1720_v19  ;;  %vm1278_vm11 = vcmp.lt.s32.totalorder %v1272_v29, %v1276_v31  ;;  %vm1277_vm8 = vcmp.lt.s32.totalorder %v3784_v59, %v1276_v31  ;;  %v4541_v29 = vpop.xlane.xlu0 %1433 }
 0x532   :  { %1821 = vmatmul.mubr.f32.gmra.mrb[44].mxu1 %v1719_v26  ;;  %vm1280_vm2 = vmand %vm1275_vm13, %vm1278_vm11 }
 0x533   :  { %2251 = vmatprep.mubr.f32.mxu1 %v3494_v1  ;;  %v1282_v28 = vsel %vm1280_vm2, 1.0, %v3494_v1  ;;  %vm1279_vm1 = vmand %vm1274_vm14, %vm1277_vm8 }
 0x534   :  { %2743 = vmatprep.subr.msk.mxu0 %vm2067_vm3, %v1282_v28 }
 0x536   :  { %2753 = vmatmul.mubr.msk.f32.vlgmr.msra.gmra.mrb[46].mxu1 %vm4984_vm12, %v4357_v37  ;;  %vm1858_vm12 = vcmask 31744  }
 0x537   :  { %2257 = vmatprep.mubr.f32.mxu1 %v3494_v1 }
 0x53a   :  { %2754 = vmatmul.mubr.msk.f32.gmra.mrb[48].mxu1 %vm4985_vm10, %v4357_v37  ;;  %vm1445_vm10 = vcmp.gt.f32.partialorder %v4517_v56, 0.0 }
 0x53b   :  { %2263 = vmatprep.mubr.f32.mxu1 %v3494_v1 }
 0x53e   :  { %2755 = vmatmul.mubr.msk.f32.gmra.mrb[50].mxu1 %vm4986_vm9, %v4357_v37  ;;  %vm1446_vm9 = vcmp.gt.f32.partialorder %v4521_v14, 0.0 }
 0x53f   :  { %2269 = vmatprep.mubr.f32.mxu1 %v3494_v1 }
 0x542   :  { %2756 = vmatmul.mubr.msk.f32.gmra.mrb[52].mxu1 %vm4987_vm6, %v4357_v37  ;;  %vm1447_vm6 = vcmp.gt.f32.partialorder %v4532_v6, 0.0 }
 0x543   :  { %2275 = vmatprep.mubr.f32.mxu1 %v3494_v1 }
 0x546   :  { %2757 = vmatmul.mubr.msk.f32.gmra.mrb[54].mxu1 %vm4988_vm7, %v4357_v37  ;;  %vm1448_vm7 = vcmp.gt.f32.partialorder %v4541_v29, 0.0 }
 0x547   :  { %2281 = vmatprep.mubr.f32.mxu1 %v3494_v1 }
 0x54a   :  { %2758 = vmatmul.mubr.msk.f32.gmra.mrb[56].mxu1 %vm4989_vm4, %v4357_v37 }
 0x54b   :  { %2287 = vmatprep.mubr.f32.mxu1 %v3494_v1 }
 0x54e   :  { %2759 = vmatmul.mubr.msk.f32.gmra.mrb[58].mxu1 %vm4990_vm15, %v4357_v37 }
 0x54f   :  { %2293 = vmatprep.mubr.f32.mxu1 %v3494_v1 }
 0x552   :  { %2760 = vmatmul.mubr.msk.f32.gmra.mrb[60].mxu1 %vm4975_vm0, %v4357_v37  ;;  %v1281_v37 = vsel %vm1279_vm1, 1.0, %v3494_v1 }
 0x553   :  { %2744 = vmatpush1.msk.msra.mxu0 %vm2067_vm3, %v1281_v37 }
 0x5e9   :  { %v2822_v23 = vpop.f32.mrb[30].mxu1 }
 0x5ea   :  { %v2823_v33 = vpop.f32.mrb[31].mxu1 }
 0x5eb   :  { %v2824_v39 = vadd.f32 %v2823_v33, %v2822_v23 }
 0x5ed   :  { %v1826_v7 = vmul.f32 0.125, %v2824_v39  ;;  %v2825_v34 = vpop.f32.mrb[32].mxu1 }
 0x5ee   :  { %v2826_v35 = vpop.f32.mrb[33].mxu1 }
 0x5ef   :  { %v1850_v36 = vsel %vm1444_vm5, %v1826_v7, -1e+30  ;;  %v2827_v10 = vadd.f32 %v2826_v35, %v2825_v34 }
 0x5f0   :  { %v1859_v62 = vsel %vm1858_vm12, %v1850_v36, -inf }
 0x5f1   :  { %v1860_v63 = vrot.slane %v1859_v62, 4  ;;  %v1827_v38 = vmul.f32 0.125, %v2827_v10  ;;  %v2828_v53 = vpop.f32.mrb[34].mxu1 }
 0x5f2   :  { %v2829_v16 = vpop.f32.mrb[35].mxu1 }
 0x5f3   :  { %v1861_v17 = vmax.f32 %v1859_v62, %v1860_v63  ;;  %v4527_v54 = vsel %vm1445_vm10, %v1827_v38, -1e+30  ;;  %v2830_v55 = vadd.f32 %v2829_v16, %v2828_v53  ;;  %v4550_v62 = vpop.xlane.xlu1 %1436 }
 0x5f4   :  { %v1866_v57 = vsel %vm1858_vm12, %v4527_v54, -inf  ;;  %vm1449_vm15 = vcmp.gt.f32.partialorder %v4550_v62, 0.0 }
 0x5f5   :  { %v1862_v60 = vrot.slane %v1861_v17, 2  ;;  %v1867_v18 = vrot.slane %v1866_v57, 4  ;;  %v1828_v21 = vmul.f32 0.125, %v2830_v55  ;;  %v2831_v61 = vpop.f32.mrb[36].mxu1 }
 0x5f6   :  { %v2832_v8 = vpop.f32.mrb[37].mxu1 }
 0x5f7   :  { %v1863_v9 = vmax.f32 %v1861_v17, %v1862_v60  ;;  %v1868_v22 = vmax.f32 %v1866_v57, %v1867_v18  ;;  %v4536_v24 = vsel %vm1446_vm9, %v1828_v21, -1e+30  ;;  %v2833_v5 = vadd.f32 %v2832_v8, %v2831_v61 }
 0x5f8   :  { %v1873_v2 = vsel %vm1858_vm12, %v4536_v24, -inf }
 0x5f9   :  { %v1864_v12 = vrot.slane %v1863_v9, 1  ;;  %v1869_v13 = vrot.slane %v1868_v22, 2  ;;  %v1874_v25 = vrot.slane %v1873_v2, 4  ;;  %v1829_v26 = vmul.f32 0.125, %v2833_v5  ;;  %v2834_v19 = vpop.f32.mrb[38].mxu1 }
 0x5fa   :  { %v2835_v30 = vpop.f32.mrb[39].mxu1 }
 0x5fb   :  { %v1865_v31 = vmax.f32 %v1863_v9, %v1864_v12  ;;  %v1870_v28 = vmax.f32 %v1868_v22, %v1869_v13  ;;  %v1875_v37 = vmax.f32 %v1873_v2, %v1874_v25  ;;  %v4545_v23 = vsel %vm1447_vm6, %v1829_v26, -1e+30  ;;  %v4557_v9 = vpop.xlane.xlu0 %1439 }
 0x5fc   :  { %v1880_v33 = vsel %vm1858_vm12, %v4545_v23, -inf  ;;  %v2836_v39 = vadd.f32 %v2835_v30, %v2834_v19  ;;  %vm1450_vm13 = vcmp.gt.f32.partialorder %v4557_v9, 0.0 }
 0x5fd   :  { %vm1915_vm4 = vcmp.le.f32.partialorder %v1865_v31, -5e+29  ;;  %v1871_v7 = vrot.slane %v1870_v28, 1  ;;  %v1876_v34 = vrot.slane %v1875_v37, 2  ;;  %v1881_v35 = vrot.slane %v1880_v33, 4  ;;  %v2837_v10 = vpop.f32.mrb[40].mxu1 }
 0x5fe   :  { %v1923_v63 = vsel %vm1915_vm4, 0.0, %v1865_v31  ;;  %v1830_v38 = vmul.f32 0.125, %v2836_v39  ;;  %v2838_v53 = vpop.f32.mrb[41].mxu1 }
 0x5ff   :  { %v1931_v16 = vsub.f32 %v1850_v36, %v1923_v63  ;;  %v1872_v17 = vmax.f32 %v1870_v28, %v1871_v7  ;;  %v1877_v55 = vmax.f32 %v1875_v37, %v1876_v34  ;;  %v1882_v57 = vmax.f32 %v1880_v33, %v1881_v35  ;;  %v4567_v28 = vpop.xlane.xlu1 %1442 }
 0x600   :  { %v4554_v60 = vsel %vm1448_vm7, %v1830_v38, -1e+30  ;;  %v2839_v18 = vadd.f32 %v2838_v53, %v2837_v10  ;;  %vm1451_vm2 = vcmp.gt.f32.partialorder %v4567_v28, 0.0 }
 0x601   :  { %v1939_v21 = vmul.f32 1.442695, %v1931_v16  ;;  %vm1916_vm0 = vcmp.le.f32.partialorder %v1872_v17, -5e+29  ;;  %v1878_v61 = vrot.slane %v1877_v55, 1  ;;  %v1883_v8 = vrot.slane %v1882_v57, 2 }
 0x602   :  { %v1924_v22 = vsel %vm1916_vm0, 0.0, %v1872_v17  ;;  %v1887_v36 = vsel %vm1858_vm12, %v4554_v60, -inf  ;;  %v1831_v5 = vmul.f32 0.125, %v2839_v18  ;;  %v2840_v2 = vpop.f32.mrb[42].mxu1 }
 0x603   :  { %3229 = vpow2.f32 %v1939_v21  ;;  %v1932_v12 = vsub.f32 %v4527_v54, %v1924_v22  ;;  %v1879_v13 = vmax.f32 %v1877_v55, %v1878_v61  ;;  %v1884_v25 = vmax.f32 %v1882_v57, %v1883_v8  ;;  %v2841_v26 = vpop.f32.mrb[43].mxu1 }
 0x604   :  { %v1888_v19 = vrot.slane %v1887_v36, 4  ;;  %v4564_v30 = vsel %vm1449_vm15, %v1831_v5, -1e+30  ;;  %v2842_v31 = vadd.f32 %v2841_v26, %v2840_v2 }
 0x605   :  { %v1941_v37 = vmul.f32 1.442695, %v1932_v12  ;;  %vm1917_vm11 = vcmp.le.f32.partialorder %v1879_v13, -5e+29  ;;  %v1885_v33 = vrot.slane %v1884_v25, 1  ;;  %v1894_v39 = vsel %vm1858_vm12, %v4564_v30, -inf }
 0x606   :  { %v1925_v54 = vsel %vm1917_vm11, 0.0, %v1879_v13  ;;  %v1889_v7 = vmax.f32 %v1887_v36, %v1888_v19  ;;  %v1895_v34 = vrot.slane %v1894_v39, 4  ;;  %v1832_v35 = vmul.f32 0.125, %v2842_v31  ;;  %v2843_v10 = vpop.f32.mrb[44].mxu1 }
 0x607   :  { %3231 = vpow2.f32 %v1941_v37  ;;  %v1933_v63 = vsub.f32 %v4536_v24, %v1925_v54  ;;  %v1886_v38 = vmax.f32 %v1884_v25, %v1885_v33  ;;  %v2844_v53 = vpop.f32.mrb[45].mxu1 }
 0x608   :  { %v1890_v16 = vrot.slane %v1889_v7, 2  ;;  %v1896_v17 = vmax.f32 %v1894_v39, %v1895_v34  ;;  %v4575_v55 = vsel %vm1450_vm13, %v1832_v35, -1e+30  ;;  %v2845_v57 = vadd.f32 %v2844_v53, %v2843_v10 }
 0x609   :  { %v1943_v18 = vmul.f32 1.442695, %v1933_v63  ;;  %vm1918_vm14 = vcmp.le.f32.partialorder %v1886_v38, -5e+29  ;;  %v1901_v21 = vsel %vm1858_vm12, %v4575_v55, -inf  ;;  %v2253_v61 = vpop.f32.mrb[46].mxu1 }
 0x60a   :  { %v1926_v8 = vsel %vm1918_vm14, 0.0, %v1886_v38  ;;  %v1891_v22 = vmax.f32 %v1889_v7, %v1890_v16  ;;  %v1897_v24 = vrot.slane %v1896_v17, 2  ;;  %v1902_v36 = vrot.slane %v1901_v21, 4  ;;  %v2255_v5 = vpop.f32.mrb[47].mxu1 }
 0x60b   :  { %3233 = vpow2.f32 %v1943_v18  ;;  %v1934_v2 = vsub.f32 %v4545_v23, %v1926_v8  ;;  %v1833_v12 = vmul.f32 0.125, %v2845_v57  ;;  %v4581_v13 = vadd.f32 %v2253_v61, %v4417_v58 }
 0x60c   :  { %v1892_v25 = vrot.slane %v1891_v22, 1  ;;  %v1898_v26 = vmax.f32 %v1896_v17, %v1897_v24  ;;  %v1903_v19 = vmax.f32 %v1901_v21, %v1902_v36  ;;  %v4584_v31 = vadd.f32 %v2255_v5, %v4419_v40 }
 0x60d   :  { %v3230_v37 = vpop.eup %3229  ;;  %v1945_v33 = vmul.f32 1.442695, %v1934_v2  ;;  %v4588_v39 = vsel %vm1451_vm2, %v1833_v12, -1e+30  ;;  %v2259_v54 = vpop.f32.mrb[48].mxu1 }
 0x60e   :  { %v4592_v23 = vsel %vm1444_vm5, %v3230_v37, 0.0  ;;  %v1893_v7 = vmax.f32 %v1891_v22, %v1892_v25  ;;  %v1899_v58 = vrot.slane %v1898_v26, 1  ;;  %v1904_v34 = vrot.slane %v1903_v19, 2  ;;  %v2261_v35 = vpop.f32.mrb[49].mxu1 }
 0x60f   :  { %v1963_v10 = vsel %vm1858_vm12, %v4592_v23, 0.0  ;;  %3235 = vpow2.f32 %v1945_v33  ;;  %v1908_v40 = vsel %vm1858_vm12, %v4588_v39, -inf  ;;  %v4599_v63 = vadd.f32 %v2259_v54, %v4421_v41 }
 0x610   :  { %v1964_v38 = vrot.slane %v1963_v10, 4  ;;  %vm1919_vm8 = vcmp.le.f32.partialorder %v1893_v7, -5e+29  ;;  %v1900_v53 = vmax.f32 %v1898_v26, %v1899_v58  ;;  %v1905_v32 = vmax.f32 %v1903_v19, %v1904_v34 }
 0x611   :  { %v3232_v16 = vpop.eup %3231  ;;  %v1927_v17 = vsel %vm1919_vm8, 0.0, %v1893_v7  ;;  %v1909_v57 = vrot.slane %v1908_v40, 4  ;;  %v4602_v18 = vadd.f32 %v2261_v35, %v4423_v42  ;;  %v2265_v21 = vpop.f32.mrb[50].mxu1 }
 0x612   :  { %v1965_v61 = vadd.f32 %v1964_v38, %v1963_v10  ;;  %v4606_v8 = vsel %vm1445_vm10, %v3232_v16, 0.0  ;;  %v1935_v22 = vsub.f32 %v4554_v60, %v1927_v17  ;;  %vm1920_vm3 = vcmp.le.f32.partialorder %v1900_v53, -5e+29  ;;  %v2267_v41 = vpop.f32.mrb[51].mxu1 }
 0x613   :  { %v1970_v24 = vsel %vm1858_vm12, %v4606_v8, 0.0  ;;  %v1928_v36 = vsel %vm1920_vm3, 0.0, %v1900_v53  ;;  %v1906_v5 = vrot.slane %v1905_v32, 1  ;;  %v1910_v2 = vmax.f32 %v1908_v40, %v1909_v57 }
 0x614   :  { %v1966_v12 = vrot.slane %v1965_v61, 2  ;;  %v1971_v25 = vrot.slane %v1970_v24, 4  ;;  %v1947_v42 = vmul.f32 1.442695, %v1935_v22  ;;  %v1936_v26 = vsub.f32 %v4564_v30, %v1928_v36 }
 0x615   :  { %v3234_v19 = vpop.eup %3233  ;;  %v1907_v37 = vmax.f32 %v1905_v32, %v1906_v5  ;;  %v1911_v56 = vrot.slane %v1910_v2, 2  ;;  %v4613_v33 = vadd.f32 %v2265_v21, %v4425_v43  ;;  %v4616_v60 = vadd.f32 %v2267_v41, %v4427_v44  ;;  %v2271_v54 = vpop.f32.mrb[52].mxu1 }
 0x616   :  { %v1967_v7 = vadd.f32 %v1966_v12, %v1965_v61  ;;  %v1972_v58 = vadd.f32 %v1971_v25, %v1970_v24  ;;  %v4620_v34 = vsel %vm1446_vm9, %v3234_v19, 0.0  ;;  %3237 = vpow2.f32 %v1947_v42  ;;  %v2273_v35 = vpop.f32.mrb[53].mxu1 }
 0x617   :  { %v1977_v30 = vsel %vm1858_vm12, %v4620_v34, 0.0  ;;  %v1949_v10 = vmul.f32 1.442695, %v1936_v26  ;;  %vm1921_vm1 = vcmp.le.f32.partialorder %v1907_v37, -5e+29  ;;  %v1912_v40 = vmax.f32 %v1910_v2, %v1911_v56 }
 0x618   :  { %v1968_v43 = vrot.slane %v1967_v7, 1  ;;  %v1973_v38 = vrot.slane %v1972_v58, 2  ;;  %v1978_v53 = vrot.slane %v1977_v30, 4  ;;  %v1929_v44 = vsel %vm1921_vm1, 0.0, %v1907_v37 }
 0x619   :  { %v3236_v32 = vpop.eup %3235  ;;  %3239 = vpow2.f32 %v1949_v10  ;;  %v1937_v16 = vsub.f32 %v4575_v55, %v1929_v44  ;;  %v1913_v17 = vrot.slane %v1912_v40, 1  ;;  %v4626_v14 = vadd.f32 %v2271_v54, %v4429_v45  ;;  %v2277_v57 = vpop.f32.mrb[54].mxu1 }
 0x61a   :  { %v1969_v21 = vadd.f32 %v1968_v43, %v1967_v7  ;;  %v1974_v61 = vadd.f32 %v1973_v38, %v1972_v58  ;;  %v1979_v22 = vadd.f32 %v1978_v53, %v1977_v30  ;;  %v4630_v41 = vsel %vm1447_vm6, %v3236_v32, 0.0  ;;  %v2279_v24 = vpop.f32.mrb[55].mxu1 }
 0x61b   :  { %v1984_v36 = vsel %vm1858_vm12, %v4630_v41, 0.0  ;;  %v1951_v5 = vmul.f32 1.442695, %v1937_v16  ;;  %v1914_v2 = vmax.f32 %v1912_v40, %v1913_v17  ;;  %v4635_v55 = vadd.f32 %v2273_v35, %v4431_v46 }
 0x61c   :  { %v2019_v12 = vadd.f32 1e-16, %v1969_v21  ;;  %v1975_v45 = vrot.slane %v1974_v61, 1  ;;  %v1980_v25 = vrot.slane %v1979_v22, 2  ;;  %v1985_v42 = vrot.slane %v1984_v36, 4 }
 0x61d   :  { %3241 = vpow2.f32 %v1951_v5  ;;  %vm1922_vm5 = vcmp.le.f32.partialorder %v1914_v2, -5e+29  ;;  %v4638_v26 = vadd.f32 %v2277_v57, %v4433_v47  ;;  %v4641_v6 = vadd.f32 %v2279_v24, %v4435_v48  ;;  %v2283_v19 = vpop.f32.mrb[56].mxu1 }
 0x61e   :  { %3243 = vrcp.f32 %v2019_v12  ;;  %v1976_v37 = vadd.f32 %v1975_v45, %v1974_v61  ;;  %v1981_v56 = vadd.f32 %v1980_v25, %v1979_v22  ;;  %v1986_v54 = vadd.f32 %v1985_v42, %v1984_v36  ;;  %v2285_v7 = vpop.f32.mrb[57].mxu1 }
 0x61f   :  { %v1930_v46 = vsel %vm1922_vm5, 0.0, %v1914_v2  ;;  %v4644_v58 = vadd.f32 %v2283_v19, %v4437_v11  ;;  %v4647_v35 = vadd.f32 %v2285_v7, %v4439_v49  ;;  %vm4991_vm6 = vcmask 523264  }
 0x620   :  { %v3238_v30 = vpop.eup %3237  ;;  %v2020_v10 = vadd.f32 1e-16, %v1976_v37  ;;  %v1982_v47 = vrot.slane %v1981_v56, 1  ;;  %v1987_v40 = vrot.slane %v1986_v54, 2  ;;  %v1938_v48 = vsub.f32 %v4588_v39, %v1930_v46 }
 0x621   :  { %v4652_v43 = vsel %vm1448_vm7, %v3238_v30, 0.0  ;;  %v2289_v38 = vpop.f32.mrb[58].mxu1  ;;  %vm4992_vm7 = vmmov 0  }
 0x622   :  { %3245 = vrcp.f32 %v2020_v10  ;;  %v1983_v53 = vadd.f32 %v1982_v47, %v1981_v56  ;;  %v1988_v44 = vadd.f32 %v1987_v40, %v1986_v54  ;;  %v1991_v11 = vsel %vm1858_vm12, %v4652_v43, 0.0  ;;  %v2291_v32 = vpop.f32.mrb[59].mxu1 }
 0x623   :  { %v3240_v49 = vpop.eup %3239  ;;  %v1992_v16 = vrot.slane %v1991_v11, 4  ;;  %v1953_v17 = vmul.f32 1.442695, %v1938_v48  ;;  %v4657_v57 = vadd.f32 %v2289_v38, %v4441_v50  ;;  %v4660_v39 = vadd.f32 %v2291_v32, %v4443_v4 }
 0x624   :  { %v2021_v29 = vadd.f32 1e-16, %v1983_v53  ;;  %v1989_v21 = vrot.slane %v1988_v44, 1  ;;  %v4664_v61 = vsel %vm1449_vm15, %v3240_v49, 0.0 }
 0x625   :  { %v1993_v22 = vadd.f32 %v1992_v16, %v1991_v11  ;;  %v1998_v24 = vsel %vm1858_vm12, %v4664_v61, 0.0  ;;  %3247 = vpow2.f32 %v1953_v17  ;;  %v2295_v36 = vpop.f32.mrb[60].mxu1 }
 0x626   :  { %3249 = vrcp.f32 %v2021_v29  ;;  %v1990_v5 = vadd.f32 %v1989_v21, %v1988_v44  ;;  %v1999_v2 = vrot.slane %v1998_v24, 4  ;;  %v4669_v50 = vadd.f32 %v2295_v36, %v4445_v51  ;;  %v2297_v4 = vpop.f32.mrb[61].mxu1 }
 0x627   :  { %v3242_v12 = vpop.eup %3241  ;;  %v1994_v45 = vrot.slane %v1993_v22, 2  ;;  %v4672_v25 = vadd.f32 %v2297_v4, %v4447_v52 }
 0x628   :  { %v3244_v62 = vpop.eup %3243  ;;  %v2022_v42 = vadd.f32 1e-16, %v1990_v5  ;;  %v2000_v19 = vadd.f32 %v1999_v2, %v1998_v24  ;;  %v1961_v37 = vsel %vm1450_vm13, %v3242_v12, 0.0 }
 0x629   :  { %v2035_v56 = vmul.f32 %v3244_v62, %v4592_v23  ;;  %v1995_v54 = vadd.f32 %v1994_v45, %v1993_v22  ;;  %v2005_v7 = vsel %vm1858_vm12, %v1961_v37, 0.0 }
 0x62a   :  { %3251 = vrcp.f32 %v2022_v42  ;;  %v2001_v51 = vrot.slane %v2000_v19, 2  ;;  %v2006_v46 = vrot.slane %v2005_v7, 4 }
 0x62b   :  { %v1996_v30 = vrot.slane %v1995_v54, 1  ;;  %2745 = vmatmul.mubr.msk.f32.vlgmr.msra.gmra.mrb[38].mxu0 %vm1858_vm12, %v2035_v56 }
 0x62c   :  { %v3246_v10 = vpop.eup %3245  ;;  %v2002_v52 = vadd.f32 %v2001_v51, %v2000_v19  ;;  %v2007_v47 = vadd.f32 %v2006_v46, %v2005_v7  ;;  %2144 = vmatprep.mubr.f32.mxu0 %v3494_v1 }
 0x62d   :  { %v2036_v40 = vmul.f32 %v3246_v10, %v4606_v8  ;;  %v1997_v9 = vadd.f32 %v1996_v30, %v1995_v54 }
 0x62e   :  { %v2003_v48 = vrot.slane %v2002_v52, 1  ;;  %v2008_v38 = vrot.slane %v2007_v47, 2 }
 0x62f   :  { %v3248_v23 = vpop.eup %3247  ;;  %v2023_v53 = vadd.f32 1e-16, %v1997_v9  ;;  %2746 = vmatmul.mubr.msk.f32.gmra.mrb[40].mxu0 %vm1858_vm12, %v2036_v40 }
 0x630   :  { %v3250_v44 = vpop.eup %3249  ;;  %v2004_v11 = vadd.f32 %v2003_v48, %v2002_v52  ;;  %v2009_v32 = vadd.f32 %v2008_v38, %v2007_v47  ;;  %v1962_v49 = vsel %vm1451_vm2, %v3248_v23, 0.0  ;;  %2150 = vmatprep.mubr.f32.mxu0 %v3494_v1 }
 0x631   :  { %v2037_v16 = vmul.f32 %v3250_v44, %v4620_v34  ;;  %3253 = vrcp.f32 %v2023_v53  ;;  %v2012_v8 = vsel %vm1858_vm12, %v1962_v49, 0.0 }
 0x632   :  { %v2024_v17 = vadd.f32 1e-16, %v2004_v11  ;;  %v2010_v29 = vrot.slane %v2009_v32, 1  ;;  %v2013_v21 = vrot.slane %v2012_v8, 4 }
 0x633   :  { %2747 = vmatmul.mubr.msk.f32.gmra.mrb[42].mxu0 %vm1858_vm12, %v2037_v16 }
 0x634   :  { %v3252_v22 = vpop.eup %3251  ;;  %3255 = vrcp.f32 %v2024_v17  ;;  %v2011_v24 = vadd.f32 %v2010_v29, %v2009_v32  ;;  %v2014_v36 = vadd.f32 %v2013_v21, %v2012_v8  ;;  %2156 = vmatprep.mubr.f32.mxu0 %v3494_v1 }
 0x635   :  { %v2038_v28 = vmul.f32 %v3252_v22, %v4630_v41 }
 0x636   :  { %v2025_v5 = vadd.f32 1e-16, %v2011_v24  ;;  %v2015_v2 = vrot.slane %v2014_v36, 2 }
 0x637   :  { %2748 = vmatmul.mubr.msk.f32.gmra.mrb[44].mxu0 %vm1858_vm12, %v2038_v28 }
 0x638   :  { %3257 = vrcp.f32 %v2025_v5  ;;  %v2016_v34 = vadd.f32 %v2015_v2, %v2014_v36  ;;  %2162 = vmatprep.mubr.f32.mxu0 %v3494_v1 }
 0x63a   :  { %v2017_v4 = vrot.slane %v2016_v34, 1 }
 0x63b   :  { %v3254_v12 = vpop.eup %3253 }
 0x63c   :  { %v2039_v45 = vmul.f32 %v3254_v12, %v4652_v43  ;;  %v2018_v62 = vadd.f32 %v2017_v4, %v2016_v34 }
 0x63e   :  { %v3256_v42 = vpop.eup %3255  ;;  %v2026_v19 = vadd.f32 1e-16, %v2018_v62  ;;  %2749 = vmatmul.mubr.msk.f32.gmra.mrb[46].mxu0 %vm1858_vm12, %v2039_v45 }
 0x63f   :  { %v2040_v56 = vmul.f32 %v3256_v42, %v4664_v61  ;;  %2168 = vmatprep.mubr.f32.mxu0 %v3494_v1 }
 0x640   :  { %3259 = vrcp.f32 %v2026_v19  ;;  %v2453_v19 = vld [vmem:[#allocation13 + $0x80] sm:$0xff] }
 0x642   :  { %v3258_v41 = vpop.eup %3257  ;;  %2750 = vmatmul.mubr.msk.f32.gmra.mrb[48].mxu0 %vm1858_vm12, %v2040_v56  ;;  %v2454_v56 = vld [vmem:[#allocation13 + $0x88] sm:$0xff] }
 0x643   :  { %v2041_v54 = vmul.f32 %v3258_v41, %v1961_v37  ;;  %2174 = vmatprep.mubr.f32.mxu0 %v3494_v1  ;;  %v2437_v41 = vld [vmem:[#allocation13] sm:$0xff] }
 0x646   :  { %2751 = vmatmul.mubr.msk.f32.gmra.mrb[50].mxu0 %vm1858_vm12, %v2041_v54  ;;  %v2438_v54 = vld [vmem:[#allocation13 + $0x8] sm:$0xff] }
 0x647   :  { %2180 = vmatprep.mubr.f32.mxu0 %v3494_v1 }
 0x64a   :  { %v3260_v43 = vpop.eup %3259 }
 0x64b   :  { %v2042_v7 = vmul.f32 %v3260_v43, %v1962_v49  ;;  %v2455_v43 = vld [vmem:[#allocation13 + $0x90] sm:$0xff] }
 0x64d   :  { %2752 = vmatmul.mubr.msk.f32.gmra.mrb[52].mxu0 %vm1858_vm12, %v2042_v7  ;;  %v2456_v7 = vld [vmem:[#allocation13 + $0x98] sm:$0xff] }
 0x64e   :  { %2383 = vmatprep.mubr.f32.mxu0 %v3494_v1 }
 0x6fe   :  { %v2140_v61 = vpop.f32.mrb[38].mxu0 }
 0x6ff   :  { %v2300_v51 = vmul.f32 %v4581_v13, %v2140_v61  ;;  %v2142_v46 = vpop.f32.mrb[39].mxu0  ;;  %v3154_v61 = vpack.c.bf16 %v2456_v7, %v2455_v43  ;;  %v2555_v7 = vld [vmem:[#allocation14 + $0x40] sm:$0xff] }
 0x700   :  { %v2301_v30 = vmul.f32 %v4584_v31, %v2142_v46  ;;  %v2440_v46 = vld [vmem:[#allocation13 + $0x18] sm:$0xff] }
 0x702   :  { %v2146_v10 = vpop.f32.mrb[40].mxu0 }
 0x703   :  { %v2302_v37 = vmul.f32 %v4599_v63, %v2146_v10  ;;  %v2148_v52 = vpop.f32.mrb[41].mxu0 }
 0x704   :  { %v2303_v47 = vmul.f32 %v4602_v18, %v2148_v52 }
 0x705   :  { %v3136_v40 = vpack.c.bf16 %v2302_v37, %v2300_v51  ;;  %v2439_v51 = vld [vmem:[#allocation13 + $0x10] sm:$0xff] }
 0x706   :  { %v3134_v9 = vpack.c.bf16 %v2303_v47, %v2301_v30  ;;  %v2152_v48 = vpop.f32.mrb[42].mxu0  ;;  %v3156_v30 = vpack.c.bf16 %v2440_v46, %v2439_v51  ;;  %v2557_v51 = vld [vmem:[#allocation14 + $0x50] sm:$0xff]  ;;  %v2558_v46 = vld [vmem:[#allocation14 + $0x58] sm:$0xff] }
 0x707   :  { %v2304_v38 = vmul.f32 %v4613_v33, %v2152_v48  ;;  %v2154_v23 = vpop.f32.mrb[43].mxu0 }
 0x708   :  { %v2305_v53 = vmul.f32 %v4616_v60, %v2154_v23  ;;  %3135 = vmatprep.subr.bf16.mxu0 %v3134_v9  ;;  %v2458_v23 = vld [vmem:[#allocation13 + $0xa8] sm:$0xff] }
 0x709   :  { %3137 = vmatpush1.bf16.msra.mxu0 %v3136_v40 }
 0x70a   :  { %v2158_v13 = vpop.f32.mrb[44].mxu0 }
 0x70b   :  { %v2306_v44 = vmul.f32 %v4626_v14, %v2158_v13  ;;  %v2160_v31 = vpop.f32.mrb[45].mxu0  ;;  %v2441_v13 = vld [vmem:[#allocation13 + $0x20] sm:$0xff] }
 0x70c   :  { %v2307_v11 = vmul.f32 %v4635_v55, %v2160_v31 }
 0x70d   :  { %v3140_v63 = vpack.c.bf16 %v2306_v44, %v2304_v38  ;;  %v2457_v38 = vld [vmem:[#allocation13 + $0xa0] sm:$0xff]  ;;  %v2442_v44 = vld [vmem:[#allocation13 + $0x28] sm:$0xff] }
 0x70e   :  { %v3138_v32 = vpack.c.bf16 %v2307_v11, %v2305_v53  ;;  %v3158_v53 = vpack.c.bf16 %v2458_v23, %v2457_v38  ;;  %v3160_v31 = vpack.c.bf16 %v2442_v44, %v2441_v13  ;;  %v2459_v11 = vld [vmem:[#allocation13 + $0xb0] sm:$0xff] }
 0x710   :  { %3139 = vmatprep.subr.bf16.mxu0 %v3138_v32 }
 0x711   :  { %v2164_v18 = vpop.f32.mrb[46].mxu0  ;;  %3141 = vmatpush1.bf16.msra.mxu0 %v3140_v63  ;;  %v2460_v63 = vld [vmem:[#allocation13 + $0xb8] sm:$0xff] }
 0x712   :  { %v2308_v49 = vmul.f32 %v4638_v26, %v2164_v18  ;;  %v2166_v16 = vpop.f32.mrb[47].mxu0  ;;  %v1112_v26 = vmul.u32 8, %v4505_v27  ;;  %v639_v27 = vsub.s32 6, %v3757_v15  ;;  %v3162_v32 = vpack.c.bf16 %v2460_v63, %v2459_v11  ;;  %v2443_v18 = vld [vmem:[#allocation13 + $0x30] sm:$0xff] }
 0x713   :  { %v2309_v33 = vmul.f32 %v4641_v6, %v2166_v16  ;;  %v1109_v6 = vmul.u32 8, %v3757_v15 }
 0x714   :  { %vm1113_vm10 = vcmp.lt.s32.totalorder %v3784_v59, %v1112_v26 }
 0x715   :  { %v2170_v8 = vpop.f32.mrb[48].mxu0  ;;  %vm1110_vm12 = vcmp.ge.s32.totalorder %v3784_v59, %v1109_v6  ;;  %v643_v59 = vsub.s32 7, %v3757_v15  ;;  %v3152_v15 = vpack.c.bf16 %v2438_v54, %v2437_v41  ;;  %v2465_v6 = vld [vmem:[#allocation13 + $0xe0] sm:$0xff]  ;;  %v2554_v54 = vld [vmem:[#allocation14 + $0x38] sm:$0xff] }
 0x716   :  { %v2310_v60 = vmul.f32 %v4644_v58, %v2170_v8  ;;  %v2172_v17 = vpop.f32.mrb[49].mxu0  ;;  %vm1114_vm9 = vmand %vm1110_vm12, %vm1113_vm10  ;;  %v2462_v8 = vld [vmem:[#allocation13 + $0xc8] sm:$0xff] }
 0x717   :  { %v2311_v29 = vmul.f32 %v4647_v35, %v2172_v17  ;;  %v2445_v17 = vld [vmem:[#allocation13 + $0x40] sm:$0xff] }
 0x718   :  { %v3144_v14 = vpack.c.bf16 %v2310_v60, %v2308_v49  ;;  %v2444_v49 = vld [vmem:[#allocation13 + $0x38] sm:$0xff] }
 0x719   :  { %v3142_v21 = vpack.c.bf16 %v2311_v29, %v2309_v33  ;;  %v2176_v22 = vpop.f32.mrb[50].mxu0  ;;  %v3164_v16 = vpack.c.bf16 %v2444_v49, %v2443_v18  ;;  %v2461_v33 = vld [vmem:[#allocation13 + $0xc0] sm:$0xff]  ;;  %v2446_v29 = vld [vmem:[#allocation13 + $0x48] sm:$0xff] }
 0x71a   :  { %v2312_v55 = vmul.f32 %v4657_v57, %v2176_v22  ;;  %v2178_v24 = vpop.f32.mrb[51].mxu0  ;;  %v3166_v60 = vpack.c.bf16 %v2462_v8, %v2461_v33  ;;  %v2464_v22 = vld [vmem:[#allocation13 + $0xd8] sm:$0xff]  ;;  %v2559_v8 = vld [vmem:[#allocation14 + $0x60] sm:$0xff] }
 0x71b   :  { %v2313_v36 = vmul.f32 %v4660_v39, %v2178_v24  ;;  %3143 = vmatprep.subr.bf16.mxu0 %v3142_v21  ;;  %v1115_v39 = vsel %vm1114_vm9, 1.0, %v3494_v1  ;;  %v2463_v21 = vld [vmem:[#allocation13 + $0xd0] sm:$0xff] }
 0x71c   :  { %3145 = vmatpush1.bf16.msra.mxu0 %v3144_v14  ;;  %v3168_v14 = vpack.c.bf16 %v2446_v29, %v2445_v17  ;;  %v2447_v24 = vld [vmem:[#allocation13 + $0x50] sm:$0xff] }
 0x720   :  { %v2182_v28 = vpop.f32.mrb[52].mxu0 }
 0x721   :  { %v2314_v58 = vmul.f32 %v4669_v50, %v2182_v28  ;;  %v2184_v5 = vpop.f32.mrb[53].mxu0  ;;  %v3267_v50 = vld [vmem:[%s4789_s12] sm:$0xff]  ;;  %v2466_v28 = vld [vmem:[#allocation13 + $0xe8] sm:$0xff] }
 0x722   :  { %v2315_v35 = vmul.f32 %v4672_v25, %v2184_v5  ;;  %v640_v25 = vrot.slane %v3267_v50, %v639_v27  ;;  %v644_v34 = vrot.slane %v3267_v50, %v643_v59  ;;  %v2449_v5 = vld [vmem:[#allocation13 + $0x60] sm:$0xff]  ;;  %v2451_v27 = vld [vmem:[#allocation13 + $0x70] sm:$0xff]  ;;  %v2452_v50 = vld [vmem:[#allocation13 + $0x78] sm:$0xff] }
 0x723   :  { %v3148_v57 = vpack.c.bf16 %v2314_v58, %v2312_v55  ;;  %v3170_v55 = vpack.c.bf16 %v2464_v22, %v2463_v21  ;;  %v3174_v58 = vpack.c.bf16 %v2466_v28, %v2465_v6 }
 0x724   :  { %v3146_v2 = vpack.c.bf16 %v2315_v35, %v2313_v36  ;;  %v2448_v36 = vld [vmem:[#allocation13 + $0x58] sm:$0xff]  ;;  %v2450_v35 = vld [vmem:[#allocation13 + $0x68] sm:$0xff] }
 0x725   :  { %v3172_v26 = vpack.c.bf16 %v2448_v36, %v2447_v24  ;;  %v2763_v24 = vld [vmem:[%s4796_s19] ss:$0 sm:$0xff] }
 0x726   :  { %3147 = vmatprep.subr.bf16.mxu0 %v3146_v2  ;;  %v2467_v2 = vld [vmem:[#allocation13 + $0xf0] sm:$0xff] }
 0x727   :  { %3149 = vmatpush1.bf16.msra.mxu0 %v3148_v57  ;;  %v3176_v57 = vpack.c.bf16 %v2450_v35, %v2449_v5 }
 0x728   :  { %3182 = vmatprep.subr.bf16.mxu0 %v3492_v0 }
 0x72a   :  { %2761 = vmatmul.mubr.msk.f32.vlgmr.msra.gmra.mrb[4].mxu0 %vm4991_vm6, %v1115_v39  ;;  %v2468_v39 = vld [vmem:[#allocation13 + $0xf8] sm:$0xff] }
 0x72b   :  { %2980 = vmatprep.mubr.msk.f32.mxu0 %vm4992_vm7, %v3494_v1  ;;  %v3150_v1 = vpack.c.bf16 %v2454_v56, %v2453_v19  ;;  %v3178_v59 = vpack.c.bf16 %v2468_v39, %v2467_v2  ;;  %v2551_v19 = vld [vmem:[#allocation14 + $0x20] sm:$0xff]  ;;  %v2552_v56 = vld [vmem:[#allocation14 + $0x28] sm:$0xff] }
 0x72c   :  { %v3189_v41 = vpack.c.bf16 %v2552_v56, %v2551_v19 }
 0x72d   :  { %3151 = vmatprep.subr.bf16.mxu1 %v3150_v1  ;;  %v2553_v1 = vld [vmem:[#allocation14 + $0x30] sm:$0xff] }
 0x72e   :  { %3153 = vmatpush3.bf16.msra.mxu1 %v3152_v15  ;;  %v3192_v43 = vpack.c.bf16 %v2554_v54, %v2553_v1  ;;  %v2556_v15 = vld [vmem:[#allocation14 + $0x48] sm:$0xff] }
 0x72f   :  { %3155 = vmatprep.subr.bf16.mxu1 %v3154_v61  ;;  %v3195_v61 = vpack.c.bf16 %v2556_v15, %v2555_v7 }
 0x732   :  { %3157 = vmatpush3.bf16.msra.mxu1 %v3156_v30  ;;  %v3198_v30 = vpack.c.bf16 %v2558_v46, %v2557_v51 }
 0x733   :  { %3159 = vmatprep.subr.bf16.mxu1 %v3158_v53 }
 0x736   :  { %3161 = vmatpush3.bf16.msra.mxu1 %v3160_v31 }
 0x737   :  { %3163 = vmatprep.subr.bf16.mxu1 %v3162_v32 }
 0x73a   :  { %3165 = vmatpush3.bf16.msra.mxu1 %v3164_v16 }
 0x73b   :  { %3167 = vmatprep.subr.bf16.mxu1 %v3166_v60  ;;  %v2560_v60 = vld [vmem:[#allocation14 + $0x68] sm:$0xff] }
 0x73c   :  { %v3201_v17 = vpack.c.bf16 %v2560_v60, %v2559_v8 }
 0x73e   :  { %3169 = vmatpush3.bf16.msra.mxu1 %v3168_v14 }
 0x73f   :  { %3171 = vmatprep.subr.bf16.mxu1 %v3170_v55 }
 0x742   :  { %3173 = vmatpush3.bf16.msra.mxu1 %v3172_v26 }
 0x743   :  { %3175 = vmatprep.subr.bf16.mxu1 %v3174_v58 }
 0x746   :  { %3177 = vmatpush3.bf16.msra.mxu1 %v3176_v57 }
 0x747   :  { %3179 = vmatprep.subr.bf16.mxu1 %v3178_v59 }
 0x7fd   :  { %v2385_v4 = vpop.f32.mrb[4].mxu0 }
 0x7fe   :  { %v3206_v12 = vadd.f32 %v2385_v4, %v640_v25  ;;  %v2387_v45 = vpop.f32.mrb[5].mxu0  ;;  %v3180_v25 = vpack.c.bf16 %v2452_v50, %v2451_v27  ;;  %v2548_v4 = vld [vmem:[#allocation14 + $0x8] sm:$0xff] }
 0x7ff   :  { %v3207_v62 = vadd.f32 %v2387_v45, %v644_v34  ;;  %v2547_v34 = vld [vmem:[#allocation14] sm:$0xff] }
 0x800   :  { %3181 = vmatpush3.bf16.msra.mxu1 %v3180_v25  ;;  %v3183_v45 = vpack.c.bf16 %v2548_v4, %v2547_v34 }
 0x801   :  { %v2390_v42 = vadd.f32 %v3207_v62, %v3206_v12 }
 0x802   :  { %3184 = vmatpush3.bf16.msra.mxu0 %v3183_v45 }
 0x803   :  { %2391 = vadd.xlane.f32.xlu0 %v2390_v42  ;;  %3185 = vmatprep.subr.bf16.mxu0 %v3492_v0 }
 0x890   :  { %v2392_v10 = vpop.xlane.xlu0 %2391 }
 0x891   :  { %v2394_v37 = vmul.f32 0.00390625, %v2392_v10 }
 0x893   :  { %v4732_v52 = vsub.f32 %v3206_v12, %v2394_v37  ;;  %v4734_v47 = vsub.f32 %v3207_v62, %v2394_v37  ;;  %v2549_v12 = vld [vmem:[#allocation14 + $0x10] sm:$0xff]  ;;  %v2550_v62 = vld [vmem:[#allocation14 + $0x18] sm:$0xff] }
 0x894   :  { %v3186_v42 = vpack.c.bf16 %v2550_v62, %v2549_v12 }
 0x895   :  { %v2397_v40 = vmul.f32 %v4732_v52, %v4732_v52  ;;  %v2398_v9 = vmul.f32 %v4734_v47, %v4734_v47 }
 0x896   :  { %3187 = vmatpush3.bf16.msra.mxu0 %v3186_v42 }
 0x897   :  { %v2399_v48 = vadd.f32 %v2398_v9, %v2397_v40  ;;  %3188 = vmatprep.subr.bf16.mxu0 %v3492_v0  ;;  %v2407_v9 = vld [vmem:[%s4791_s14] sm:$0x3] }
 0x898   :  { %v2412_v38 = vrot.slane %v2407_v9, %v3795_v3  ;;  %v2416_v23 = vrot.slane %v2407_v9, %v3762_v20 }
 0x899   :  { %2400 = vadd.xlane.f32.xlu1 %v2399_v48  ;;  %v2421_v48 = vld [vmem:[%s4792_s15] sm:$0x3] }
 0x89a   :  { %3190 = vmatpush3.bf16.msra.mxu0 %v3189_v41  ;;  %v2426_v31 = vrot.slane %v2421_v48, %v3795_v3  ;;  %v2430_v11 = vrot.slane %v2421_v48, %v3762_v20  ;;  %v2762_v20 = vld [vmem:[%s4794_s17] ss:$0 sm:$0xff]  ;;  %s3496_s17 = smov [#allocation16]  }
 0x89b   :  { %3191 = vmatprep.subr.bf16.mxu0 %v3492_v0  ;;  %s2657_s4 = sshll.u32 %s3496_s17, 4  ;;  %s2658_s4 = int_to_ptr.vmem [resolvable:$true] %s2657_s4 }
 0x89c   :  { %s3444_s19 = scalar_lea.vmem %s2658_s4, 128  ;;  %p3449_p9 = scmp.lt.s32.totalorder %s2658_s4, %s2658_s4 }
 0x89d   :  { %p3445_p8 = scmp.ne.s32.totalorder %s2658_s4, %s3444_s19  ;;  %p3450_p10 = scmp.lt.s32.totalorder %s3444_s19, %s3444_s19 }
 0x89e   :  { %3193 = vmatpush3.bf16.msra.mxu0 %v3192_v43 }
 0x89f   :  { %3194 = vmatprep.subr.bf16.mxu0 %v3492_v0  ;;  %p3451_p11 = por %p3450_p10, %p3449_p9 }
 0x8a1   :  { %p3452_p12 = pnand %p3451_p11, %p3445_p8 }
 0x8a2   :  { %3196 = vmatpush3.bf16.msra.mxu0 %v3195_v61 }
 0x8a3   :  { %3197 = vmatprep.subr.bf16.mxu0 %v3492_v0 }
 0x8a6   :  { %3199 = vmatpush3.bf16.msra.mxu0 %v3198_v30 }
 0x8a7   :  { %3200 = vmatprep.subr.bf16.mxu0 %v3492_v0 }
 0x8aa   :  { %3202 = vmatpush3.bf16.msra.mxu0 %v3201_v17 }
 0x8ab   :  { %3203 = vmatprep.subr.bf16.mxu0 %v3492_v0 }
 0x926   :  { %v2401_v10 = vpop.xlane.xlu1 %2400 }
 0x927   :  { %v2402_v37 = vmul.f32 0.00390625, %v2401_v10 }
 0x929   :  { %v2403_v40 = vadd.f32 1e-05, %v2402_v37 }
 0x92b   :  { %3261 = vrsqrt.f32 %v2403_v40 }
 0x935   :  { %v3262_v53 = vpop.eup %3261 }
 0x936   :  { %v2405_v13 = vmul.f32 %v3262_v53, %v4732_v52  ;;  %v2406_v44 = vmul.f32 %v3262_v53, %v4734_v47  ;;  %v2561_v52 = vld [vmem:[#allocation14 + $0x70] sm:$0xff]  ;;  %v2562_v47 = vld [vmem:[#allocation14 + $0x78] sm:$0xff] }
 0x937   :  { %v3204_v29 = vpack.c.bf16 %v2562_v47, %v2561_v52 }
 0x938   :  { %v2419_v63 = vmul.f32 %v2412_v38, %v2405_v13  ;;  %v2420_v32 = vmul.f32 %v2416_v23, %v2406_v44 }
 0x939   :  { %3205 = vmatpush3.bf16.msra.mxu0 %v3204_v29 }
 0x93a   :  { %v2433_v18 = vadd.f32 %v2426_v31, %v2419_v63  ;;  %v2434_v49 = vadd.f32 %v2430_v11, %v2420_v32 }
 0x93c   :  { %v2435_v16 = vmax.f32 %v2433_v18, 0.0  ;;  %v2436_v33 = vmax.f32 %v2434_v49, 0.0 }
 0x93e   :  { %2540 = vmatprep.mubr.f32.mxu1 %v2436_v33 }
 0x93f   :  { %2541 = vmatmul.mubr.f32.vlgmr.msra.gmra.mrb[62].mxu1 %v2435_v16 }
 0xa12   :  { %v2878_v3 = vpop.f32.mrb[62].mxu1 }
 0xa13   :  { %v2879_v14 = vpop.f32.mrb[63].mxu1 }
 0xa14   :  { %v2880_v21 = vadd.f32 %v2879_v14, %v2878_v3 }
 0xa16   :  { %v2543_v22 = vadd.f32 %v2880_v21, %v2762_v20 }
 0xa18   :  { %v2546_v55 = vmax.f32 %v2543_v22, 0.0 }
 0xa1a   :  { %2981 = vmatmul.mubr.f32.vlgmr.msra.gmra.mrb[54].mxu0 %v2546_v55 }
 0xaed   :  { %v2636_v36 = vpop.f32.mrb[54].mxu0 }
 0xaee   :  { %v2637_v0 = vadd.f32 %v2763_v24, %v2636_v36  ;;  %v2982_v26 = vpop.f32.mrb[55].mxu0 }
 0xaf0   :  { %2640 = vmax.xlane.f32.xlu0 %v2637_v0 }
 0xb7d   :  { %v2641_v6 = vpop.xlane.xlu0 %2640 }
 0xb7e   :  { %v2642_v28 = vsub.f32 %v2637_v0, %v2641_v6 }
 0xb80   :  { %v2643_v58 = vmul.f32 1.442695, %v2642_v28 }
 0xb82   :  { %3263 = vpow2.f32 %v2643_v58 }
 0xb8c   :  { %v3264_v5 = vpop.eup %3263 }
 0xb8d   :  { %2645 = vadd.xlane.f32.xlu1 %v3264_v5 }
 0xc1a   :  { %v2646_v35 = vpop.xlane.xlu1 %2645 }
 0xc1b   :  { %3265 = vlog2.f32 %v2646_v35 }
 0xc25   :  { %v3266_v57 = vpop.eup %3265 }
 0xc26   :  { %v2648_v2 = vmul.f32 0.6931472, %v3266_v57 }
 0xc28   :  { %v2649_v39 = vsub.f32 %v2642_v28, %v2648_v2 }
 0xc2a   :  { %2650 = vst [vmem:[#allocation16] sm:$0xff] %v2649_v39 }
 0xc2b   :  { %3455 = shalt.err (!%p3452_p12)
}
 0xc2c   :  { %s3456_s29 = scalar_lea.hbm %s4797_s20, 128 }
 0xc2d   :  { %p3457_p13 = scmp.ne.s32.totalorder %s4797_s20, %s3456_s29  ;;  %p3460_p0 = scmp.lt.u32.totalorder %s3456_s29, %s4797_s20 }
 0xc2f   :  { %p3462_p1 = pnand %p3460_p0, %p3457_p13 }
 0xc31   :  { %3465 = shalt.err (!%p3462_p1)
}
 0xc32   :  { %2660 = dma.vmem_to_hbm [thread:$0]  %s2658_s4, 128, %s4797_s20, [#allocation4]  }
 0xc33   :  { %3476 = dma.done.wait [#allocation4], 128  }
 0xc34   :  { %3477 = vsyncadd [#allocation4], 4294967168 }
 0xc35   :  { %2664 = vsyncpa [#allocation3], 1 }
 0xc36   :  { %2665 = vsyncpa [#allocation6], 1 }
 0xc37   :  { %2666 = vsyncpa [#allocation9], 1 }
 0xc38   :  { %2667 = vsyncpa [#allocation12], 1 }
 0xc39   :  { %2668 = vsyncpa [#allocation15], 1 }
 0xc3a   :  { %2669 = vsyncpa [#allocation4], 1 }

</bundles_post_ra>
